<compile_context>
chip_gen: v6e
topology: v6e:2x2x1
jax: 0.10.0
libtpu: 0.0.40
codegen_flags: <defaults>
</compile_context>

<pallas_src>
import functools

import jax
import jax.numpy as jnp
from jax import lax
from jax.experimental import pallas as pl
from jax.experimental.pallas import tpu as pltpu


def _round_up(x, m):
    return (x + m - 1) // m * m


def _mm3(w_ref, ci, b_ref, taps):
    """3-tap conv = three accumulating bf16 MXU matmuls (f32 acc) + bias.

    taps: (minus, center, plus) bf16 arrays of shape (R, W8, Cp) matching weight tap
    order 0/1/2.  Returns a 2D f32 (R*W8, Cp) accumulator.
    """
    cp = taps[0].shape[-1]
    acc = None
    for k, tap in enumerate(taps):
        y = jnp.dot(tap.reshape(-1, cp), w_ref[ci, k],
                    preferred_element_type=jnp.float32)
        acc = y if acc is None else acc + y
    return acc + b_ref[ci]


def _row_conv(x, w_ref, ci, b_ref, d):
    """(3,1) conv with dilation d: taps are row slices of the halo'd slab (no copies)."""
    r, w8, cp = x.shape
    taps = (x[:r - 2 * d], x[d:r - d], x[2 * d:])
    return _mm3(w_ref, ci, b_ref, taps).reshape(r - 2 * d, w8, cp)


def _col_conv(x, w_ref, ci, b_ref, d):
    """(1,3) conv with dilation d: bf16 zero-concat column shifts (image edge = slab edge)."""
    r, w8, cp = x.shape
    z = jnp.zeros((r, d, cp), x.dtype)
    xm = jnp.concatenate([z, x[:, :w8 - d, :]], axis=1)   # value at col - d
    xp = jnp.concatenate([x[:, d:, :], z], axis=1)        # value at col + d
    return _mm3(w_ref, ci, b_ref, (xm, x, xp)).reshape(r, w8, cp)


def _nb1d_kernel(dilated, img_h, halo, img_w,
                 x_hbm, w_ref, b_ref, o_ref, xbuf, sem):
    n = pl.program_id(0)
    t = pl.program_id(1)
    nt = pl.num_programs(1)
    th = o_ref.shape[1]                  # output rows per tile
    _, ht, w8, cp = xbuf.shape           # ht = th + 2*halo
    bf = jnp.bfloat16

    def fetch(tt, slot):
        r0 = pl.multiple_of(tt * th, th)
        pltpu.make_async_copy(x_hbm.at[n, pl.ds(r0, ht)], xbuf.at[slot],
                              sem.at[slot]).start()

    # Manual double buffering of the overlapping (halo'd) input window.  The tile axis is
    # 'arbitrary', so per core the tiles of an image run in order and the prefetch of tile
    # t+1 is exactly what the next grid step waits on.
    @pl.when(t == 0)
    def _():
        fetch(t, 0)

    @pl.when(t + 1 < nt)
    def _():
        fetch(t + 1, (t + 1) & 1)

    slot = t & 1
    row0 = t * th
    pltpu.make_async_copy(x_hbm.at[n, pl.ds(row0, ht)], xbuf.at[slot],
                          sem.at[slot]).wait()

    x = xbuf[slot]                                        # (ht, W8, Cp) bf16

    # conv3x1_1 (rows, d=1) -> tanh ; covers padded rows [row0+1, row0+ht-1)
    y = jnp.tanh(_row_conv(x, w_ref, 0, b_ref, 1)).astype(bf)

    # Re-zero the W round-up pad columns so the column conv sees true image-edge zeros.
    if w8 != img_w:
        col = lax.broadcasted_iota(jnp.int32, (1, w8, 1), 1)
        y = jnp.where(col < img_w, y, jnp.zeros_like(y))

    # conv1x3_1 (cols, d=1) -> tanh
    y = jnp.tanh(_col_conv(y, w_ref, 1, b_ref, 1)).astype(bf)

    # Zero the rows lying outside the true image so the dilated row conv's zero padding
    # happens at the *image* boundary (PyTorch semantics), not at tile/round-up boundaries.
    rows = lax.broadcasted_iota(jnp.int32, (ht - 2, 1, 1), 0) + (row0 + 1)
    y = jnp.where((rows >= halo) & (rows < halo + img_h), y, jnp.zeros_like(y))

    # conv3x1_2 (rows, d=dilated) -> tanh ; shrinks to the th output rows
    y = jnp.tanh(_row_conv(y, w_ref, 2, b_ref, dilated)).astype(bf)
    if w8 != img_w:
        y = jnp.where(col < img_w, y, jnp.zeros_like(y))

    # conv1x3_2 (cols, d=dilated) ; f32
    y = _col_conv(y, w_ref, 3, b_ref, dilated)

    # dropout: p == 0 -> skipped (same as the PyTorch forward).
    # Residual re-read from the input tile (not kept live across the convs), final tanh.
    o_ref[0] = jnp.tanh(y + x[halo:halo + th].astype(jnp.float32))


def non_bottleneck_1d_pallas(x_nchw, params, dilated, *,
                             row_block=32, vmem_tile_budget_bytes=36 * 2 ** 20):
    """Forward pass of non_bottleneck_1d (dropprob=0). x_nchw: (N, C, H, W) float32."""
    N, C, H, W = x_nchw.shape
    assert dilated >= 1, "dilation must be >= 1"
    assert dilated < W, "dilated >= W not supported by the column-shift construction"

    Cp = _round_up(C, 128)            # lane-dense channel dimension
    W8 = _round_up(W, 8)              # sublane-aligned width
    halo = dilated + 1                # rows of context needed per side

    def vmem_est(th_):
        ht_ = th_ + 2 * halo
        return (2 * ht_ * W8 * Cp * 2        # double-buffered bf16 input tile
                + 2 * th_ * W8 * Cp * 4      # double-buffered f32 output block
                + 5 * ht_ * W8 * Cp * 4)     # conservative in-flight temporaries

    th = max(1, min(row_block, H))
    while th > 1 and vmem_est(th) > vmem_tile_budget_bytes:
        th = max(1, th // 2)
    n_tiles = -(-H // th)
    Hp = n_tiles * th                 # H rounded up to the row tile
    HP = Hp + 2 * halo
    ht = th + 2 * halo

    # NHWC, bf16, channel-padded to Cp, zero halo / round-up rows, W padded to W8.
    x_nhwc = jnp.transpose(x_nchw, (0, 2, 3, 1)).astype(jnp.bfloat16)
    x_pad = jnp.zeros((N, HP, W8, Cp), jnp.bfloat16)
    x_pad = x_pad.at[:, halo:halo + H, :W, :C].set(x_nhwc)
    # TODO(synk): the bf16 padded copy above is still a wrapper-side HBM materialization;
    # a fully fused variant would DMA the raw NHWC tensor and zero-fill pad lanes in VMEM.

    def pack_w(w_oihw, taps_on_h):
        w3 = w_oihw[:, :, :, 0] if taps_on_h else w_oihw[:, :, 0, :]    # (Cout, Cin, 3)
        w3 = jnp.transpose(w3, (2, 1, 0))                               # (3, Cin, Cout)
        return jnp.zeros((3, Cp, Cp), jnp.float32).at[:, :C, :C].set(w3)

    wpack = jnp.stack([pack_w(params['w1'], True), pack_w(params['w2'], False),
                       pack_w(params['w3'], True), pack_w(params['w4'], False)],
                      axis=0).astype(jnp.bfloat16)                       # (4, 3, Cp, Cp)
    bpack = jnp.stack(
        [jnp.zeros((Cp,), jnp.float32).at[:C].set(params[f'b{i}']) for i in (1, 2, 3, 4)],
        axis=0).reshape(4, 1, Cp)                                        # (4, 1, Cp)

    est = vmem_est(th)
    vmem_limit = int(min(64 * 2 ** 20, max(32 * 2 ** 20, 2 * est)))      # also valid on v7x

    flops = 4 * 3 * 2 * N * n_tiles * ht * W8 * Cp * Cp
    transcendentals = 4 * N * n_tiles * ht * W8 * Cp
    bytes_accessed = (N * n_tiles * ht * W8 * Cp * 2      # bf16 input tiles (incl. halos)
                      + N * Hp * W8 * Cp * 4              # f32 output
                      + wpack.size * 2 + bpack.size * 4)  # resident weights / biases

    out = pl.pallas_call(
        functools.partial(_nb1d_kernel, dilated, H, halo, W),
        out_shape=jax.ShapeDtypeStruct((N, Hp, W8, Cp), jnp.float32),
        grid=(N, n_tiles),
        in_specs=[
            pl.BlockSpec(memory_space=pl.ANY),                          # x stays in HBM
            pl.BlockSpec((4, 3, Cp, Cp), lambda n, t: (0, 0, 0, 0)),    # resident weights
            pl.BlockSpec((4, 1, Cp), lambda n, t: (0, 0, 0)),           # resident biases
        ],
        out_specs=pl.BlockSpec((1, th, W8, Cp), lambda n, t: (n, t, 0, 0)),
        scratch_shapes=[
            pltpu.VMEM((2, ht, W8, Cp), jnp.bfloat16),   # double-buffered input tile
            pltpu.SemaphoreType.DMA((2,)),               # one semaphore per slot
        ],
        compiler_params=pltpu.CompilerParams(
            dimension_semantics=("parallel", "arbitrary"),
            vmem_limit_bytes=vmem_limit,
        ),
        cost_estimate=pl.CostEstimate(flops=int(flops),
                                      transcendentals=int(transcendentals),
                                      bytes_accessed=int(bytes_accessed)),
    )(x_pad, wpack, bpack)

    out = out[:, :H, :W, :C]
    # These transposes only exist because the PyTorch module is NCHW; feed NHWC
    # activations end-to-end in a real pipeline to avoid the extra HBM round trips.
    return jnp.transpose(out, (0, 3, 1, 2))


def _ref_forward(x, params, dilated):
    """Plain-JAX reference in NCHW, mirroring the PyTorch module (dropprob=0)."""
    def conv(x, w, b, pad, dil):
        y = lax.conv_general_dilated(
            x, w, window_strides=(1, 1), padding=pad, rhs_dilation=dil,
            dimension_numbers=('NCHW', 'OIHW', 'NCHW'))
        return y + b[None, :, None, None]

    d = dilated
    out = jnp.tanh(conv(x,   params['w1'], params['b1'], ((1, 1), (0, 0)), (1, 1)))
    out = jnp.tanh(conv(out, params['w2'], params['b2'], ((0, 0), (1, 1)), (1, 1)))
    out = jnp.tanh(conv(out, params['w3'], params['b3'], ((d, d), (0, 0)), (d, 1)))
    out = conv(out, params['w4'], params['b4'], ((0, 0), (d, d)), (1, d))
    return jnp.tanh(out + x)


if __name__ == "__main__":
    N, C, H, W = 2, 4, 16, 16

    key = jax.random.PRNGKey(0)
    keys = jax.random.split(key, 9)
    params = {
        'w1': 0.1 * jax.random.normal(keys[0], (C, C, 3, 1), jnp.float32),
        'b1': 0.1 * jax.random.normal(keys[1], (C,), jnp.float32),
        'w2': 0.1 * jax.random.normal(keys[2], (C, C, 1, 3), jnp.float32),
        'b2': 0.1 * jax.random.normal(keys[3], (C,), jnp.float32),
        'w3': 0.1 * jax.random.normal(keys[4], (C, C, 3, 1), jnp.float32),
        'b3': 0.1 * jax.random.normal(keys[5], (C,), jnp.float32),
        'w4': 0.1 * jax.random.normal(keys[6], (C, C, 1, 3), jnp.float32),
        'b4': 0.1 * jax.random.normal(keys[7], (C,), jnp.float32),
    }
    x = jax.random.normal(keys[8], (N, C, H, W), jnp.float32)

    # Multi-tile, non-dividing-tile and single-tile paths, for two dilations.
    for dilated, rb in ((1, 8), (2, 5), (2, 8), (2, 32)):
        ref = jax.block_until_ready(_ref_forward(x, params, dilated))
        out = jax.block_until_ready(
            non_bottleneck_1d_pallas(x, params, dilated, row_block=rb))
        assert out.shape == (N, C, H, W)
        err = float(jnp.max(jnp.abs(out - ref)))
        # bf16 activations / matmul operands (f32 accumulation) -> relaxed tolerance.
        assert jnp.allclose(out, ref, atol=3e-2, rtol=3e-2), \
            f"dilated={dilated} row_block={rb}: max abs err {err}"

    # Width not a multiple of 8 (exercises the pad-column masking path).
    x_odd = x[:, :, :, :12]
    ref = jax.block_until_ready(_ref_forward(x_odd, params, 2))
    out = jax.block_until_ready(
        non_bottleneck_1d_pallas(x_odd, params, 2, row_block=8))
    err = float(jnp.max(jnp.abs(out - ref)))
    assert jnp.allclose(out, ref, atol=3e-2, rtol=3e-2), \
        f"odd width: max abs err {err}"

    print("KERNEL_OK")
</pallas_src>

<mosaic_0001>
module attributes {stable_mosaic.version = 11 : i64} {
  func.func @_nb1d_kernel(%arg0: i32, %arg1: i32, %arg2: memref<2x20x16x128xbf16, #tpu.memory_space<any>>, %arg3: memref<4x3x128x128xbf16, #tpu.memory_space<vmem>>, %arg4: memref<4x1x128xf32, #tpu.memory_space<vmem>>, %arg5: memref<1x8x16x128xf32, #tpu.memory_space<vmem>>, %arg6: memref<2x12x16x128xbf16, #tpu.memory_space<vmem>>, %arg7: memref<2x!tpu.dma_semaphore, #tpu.memory_space<semaphore_mem>>) attributes {dimension_semantics = [#tpu.dimension_semantics<parallel>, #tpu.dimension_semantics<arbitrary>], iteration_bounds = array<i64: 2, 2>, scalar_prefetch = 0 : i64, scratch_operands = 2 : i64, tpu.core_type = #tpu.core_type<tc>, window_params = [{}, {pipeline_mode = #tpu.pipeline_mode<synchronous>, transform_indices = @transform_1, window_bounds = array<i64: 4, 3, 128, 128>}, {pipeline_mode = #tpu.pipeline_mode<synchronous>, transform_indices = @transform_2, window_bounds = array<i64: 4, 1, 128>}, {transform_indices = @transform_3, window_bounds = array<i64: 1, 8, 16, 128>}]} {
    %c0_i32 = arith.constant 0 : i32
    %0 = arith.cmpi eq, %arg1, %c0_i32 : i32
    %1 = arith.extui %0 : i1 to i32
    %c0_i32_0 = arith.constant 0 : i32
    %2 = arith.cmpi ne, %1, %c0_i32_0 : i32
    scf.if %2 {
      %c8_i32_87 = arith.constant 8 : i32
      %136 = arith.muli %arg1, %c8_i32_87 : i32
      %137 = tpu.assume_multiple %136, 8 : i32
      %c0_i32_88 = arith.constant 0 : i32
      %c0_i32_89 = arith.constant 0 : i32
      %c0_i32_90 = arith.constant 0 : i32
      %c0_i32_91 = arith.constant 0 : i32
      %138 = tpu.memref_slice %arg2[%arg0, %137, %c0_i32_90, %c0_i32_91] : memref<2x20x16x128xbf16, #tpu.memory_space<any>> -> memref<1x12x16x128xbf16, #tpu.memory_space<any>>
      %139 = tpu.memref_squeeze %138 : memref<1x12x16x128xbf16, #tpu.memory_space<any>> -> memref<12x16x128xbf16, #tpu.memory_space<any>>
      %c0_i32_92 = arith.constant 0 : i32
      %c0_i32_93 = arith.constant 0 : i32
      %c0_i32_94 = arith.constant 0 : i32
      %140 = tpu.memref_slice %arg6[%c0_i32_88, %c0_i32_92, %c0_i32_93, %c0_i32_94] : memref<2x12x16x128xbf16, #tpu.memory_space<vmem>> -> memref<1x12x16x128xbf16, #tpu.memory_space<vmem>>
      %141 = tpu.memref_squeeze %140 : memref<1x12x16x128xbf16, #tpu.memory_space<vmem>> -> memref<12x16x128xbf16, #tpu.memory_space<vmem>>
      %142 = tpu.memref_slice %arg7[%c0_i32_89] : memref<2x!tpu.dma_semaphore, #tpu.memory_space<semaphore_mem>> -> memref<1x!tpu.dma_semaphore, #tpu.memory_space<semaphore_mem>>
      %143 = tpu.memref_squeeze %142 : memref<1x!tpu.dma_semaphore, #tpu.memory_space<semaphore_mem>> -> memref<!tpu.dma_semaphore, #tpu.memory_space<semaphore_mem>>
      tpu.enqueue_dma source(%139 : memref<12x16x128xbf16, #tpu.memory_space<any>>) target(%141 : memref<12x16x128xbf16, #tpu.memory_space<vmem>>) target_semaphore(%143 : memref<!tpu.dma_semaphore, #tpu.memory_space<semaphore_mem>>)
    } else {
    }
    %c1_i32 = arith.constant 1 : i32
    %3 = arith.addi %arg1, %c1_i32 : i32
    %c2_i32 = arith.constant 2 : i32
    %4 = arith.cmpi slt, %3, %c2_i32 : i32
    %5 = arith.extui %4 : i1 to i32
    %c0_i32_1 = arith.constant 0 : i32
    %6 = arith.cmpi ne, %5, %c0_i32_1 : i32
    scf.if %6 {
      %c1_i32_87 = arith.constant 1 : i32
      %136 = arith.addi %arg1, %c1_i32_87 : i32
      %c1_i32_88 = arith.constant 1 : i32
      %137 = arith.addi %arg1, %c1_i32_88 : i32
      %c1_i32_89 = arith.constant 1 : i32
      %138 = arith.andi %137, %c1_i32_89 : i32
      %c8_i32_90 = arith.constant 8 : i32
      %139 = arith.muli %136, %c8_i32_90 : i32
      %140 = tpu.assume_multiple %139, 8 : i32
      %c0_i32_91 = arith.constant 0 : i32
      %c0_i32_92 = arith.constant 0 : i32
      %141 = tpu.memref_slice %arg2[%arg0, %140, %c0_i32_91, %c0_i32_92] : memref<2x20x16x128xbf16, #tpu.memory_space<any>> -> memref<1x12x16x128xbf16, #tpu.memory_space<any>>
      %142 = tpu.memref_squeeze %141 : memref<1x12x16x128xbf16, #tpu.memory_space<any>> -> memref<12x16x128xbf16, #tpu.memory_space<any>>
      %c0_i32_93 = arith.constant 0 : i32
      %c0_i32_94 = arith.constant 0 : i32
      %c0_i32_95 = arith.constant 0 : i32
      %143 = tpu.memref_slice %arg6[%138, %c0_i32_93, %c0_i32_94, %c0_i32_95] : memref<2x12x16x128xbf16, #tpu.memory_space<vmem>> -> memref<1x12x16x128xbf16, #tpu.memory_space<vmem>>
      %144 = tpu.memref_squeeze %143 : memref<1x12x16x128xbf16, #tpu.memory_space<vmem>> -> memref<12x16x128xbf16, #tpu.memory_space<vmem>>
      %145 = tpu.memref_slice %arg7[%138] : memref<2x!tpu.dma_semaphore, #tpu.memory_space<semaphore_mem>> -> memref<1x!tpu.dma_semaphore, #tpu.memory_space<semaphore_mem>>
      %146 = tpu.memref_squeeze %145 : memref<1x!tpu.dma_semaphore, #tpu.memory_space<semaphore_mem>> -> memref<!tpu.dma_semaphore, #tpu.memory_space<semaphore_mem>>
      tpu.enqueue_dma source(%142 : memref<12x16x128xbf16, #tpu.memory_space<any>>) target(%144 : memref<12x16x128xbf16, #tpu.memory_space<vmem>>) target_semaphore(%146 : memref<!tpu.dma_semaphore, #tpu.memory_space<semaphore_mem>>)
    } else {
    }
    %c1_i32_2 = arith.constant 1 : i32
    %7 = arith.andi %arg1, %c1_i32_2 : i32
    %c8_i32 = arith.constant 8 : i32
    %8 = arith.muli %arg1, %c8_i32 : i32
    %c0_i32_3 = arith.constant 0 : i32
    %c0_i32_4 = arith.constant 0 : i32
    %9 = tpu.memref_slice %arg2[%arg0, %8, %c0_i32_3, %c0_i32_4] : memref<2x20x16x128xbf16, #tpu.memory_space<any>> -> memref<1x12x16x128xbf16, #tpu.memory_space<any>>
    %10 = tpu.memref_squeeze %9 : memref<1x12x16x128xbf16, #tpu.memory_space<any>> -> memref<12x16x128xbf16, #tpu.memory_space<any>>
    %c0_i32_5 = arith.constant 0 : i32
    %c0_i32_6 = arith.constant 0 : i32
    %c0_i32_7 = arith.constant 0 : i32
    %11 = tpu.memref_slice %arg6[%7, %c0_i32_5, %c0_i32_6, %c0_i32_7] : memref<2x12x16x128xbf16, #tpu.memory_space<vmem>> -> memref<1x12x16x128xbf16, #tpu.memory_space<vmem>>
    %12 = tpu.memref_squeeze %11 : memref<1x12x16x128xbf16, #tpu.memory_space<vmem>> -> memref<12x16x128xbf16, #tpu.memory_space<vmem>>
    %13 = tpu.memref_slice %arg7[%7] : memref<2x!tpu.dma_semaphore, #tpu.memory_space<semaphore_mem>> -> memref<1x!tpu.dma_semaphore, #tpu.memory_space<semaphore_mem>>
    %14 = tpu.memref_squeeze %13 : memref<1x!tpu.dma_semaphore, #tpu.memory_space<semaphore_mem>> -> memref<!tpu.dma_semaphore, #tpu.memory_space<semaphore_mem>>
    tpu.wait_dma2 semaphore(%14 : memref<!tpu.dma_semaphore, #tpu.memory_space<semaphore_mem>>) src(%10 : memref<12x16x128xbf16, #tpu.memory_space<any>>) dst(%12 : memref<12x16x128xbf16, #tpu.memory_space<vmem>>)
    %15 = arith.index_cast %7 : i32 to index
    %c0 = arith.constant 0 : index
    %c0_8 = arith.constant 0 : index
    %c0_9 = arith.constant 0 : index
    %16 = vector.load %arg6[%15, %c0, %c0_8, %c0_9] : memref<2x12x16x128xbf16, #tpu.memory_space<vmem>>, vector<1x12x16x128xbf16>
    %17 = vector.shape_cast %16 : vector<1x12x16x128xbf16> to vector<12x16x128xbf16>
    %18 = vector.extract_strided_slice %17 {offsets = [0, 0, 0], sizes = [10, 16, 128], strides = [1, 1, 1]} : vector<12x16x128xbf16> to vector<10x16x128xbf16>
    %19 = vector.extract_strided_slice %17 {offsets = [1, 0, 0], sizes = [10, 16, 128], strides = [1, 1, 1]} : vector<12x16x128xbf16> to vector<10x16x128xbf16>
    %20 = vector.extract_strided_slice %17 {offsets = [2, 0, 0], sizes = [10, 16, 128], strides = [1, 1, 1]} : vector<12x16x128xbf16> to vector<10x16x128xbf16>
    %21 = vector.shape_cast %18 : vector<10x16x128xbf16> to vector<160x128xbf16>
    %c0_10 = arith.constant 0 : index
    %c0_11 = arith.constant 0 : index
    %c0_12 = arith.constant 0 : index
    %c0_13 = arith.constant 0 : index
    %22 = vector.load %arg3[%c0_10, %c0_11, %c0_12, %c0_13] : memref<4x3x128x128xbf16, #tpu.memory_space<vmem>>, vector<1x1x128x128xbf16>
    %23 = vector.shape_cast %22 : vector<1x1x128x128xbf16> to vector<128x128xbf16>
    %cst = arith.constant dense<0.000000e+00> : vector<160x128xf32>
    %24 = tpu.matmul %21, %23, %cst {dimension_numbers = #tpu.dot_dimension_numbers<[1], [0], [0], [1], [0, 0, 1, 1], [], []>} : vector<160x128xbf16>, vector<128x128xbf16>, vector<160x128xf32> -> vector<160x128xf32>
    %25 = vector.shape_cast %19 : vector<10x16x128xbf16> to vector<160x128xbf16>
    %c0_14 = arith.constant 0 : index
    %c1 = arith.constant 1 : index
    %c0_15 = arith.constant 0 : index
    %c0_16 = arith.constant 0 : index
    %26 = vector.load %arg3[%c0_14, %c1, %c0_15, %c0_16] : memref<4x3x128x128xbf16, #tpu.memory_space<vmem>>, vector<1x1x128x128xbf16>
    %27 = vector.shape_cast %26 : vector<1x1x128x128xbf16> to vector<128x128xbf16>
    %cst_17 = arith.constant dense<0.000000e+00> : vector<160x128xf32>
    %28 = tpu.matmul %25, %27, %cst_17 {dimension_numbers = #tpu.dot_dimension_numbers<[1], [0], [0], [1], [0, 0, 1, 1], [], []>} : vector<160x128xbf16>, vector<128x128xbf16>, vector<160x128xf32> -> vector<160x128xf32>
    %29 = arith.addf %24, %28 : vector<160x128xf32>
    %30 = vector.shape_cast %20 : vector<10x16x128xbf16> to vector<160x128xbf16>
    %c0_18 = arith.constant 0 : index
    %c2 = arith.constant 2 : index
    %c0_19 = arith.constant 0 : index
    %c0_20 = arith.constant 0 : index
    %31 = vector.load %arg3[%c0_18, %c2, %c0_19, %c0_20] : memref<4x3x128x128xbf16, #tpu.memory_space<vmem>>, vector<1x1x128x128xbf16>
    %32 = vector.shape_cast %31 : vector<1x1x128x128xbf16> to vector<128x128xbf16>
    %cst_21 = arith.constant dense<0.000000e+00> : vector<160x128xf32>
    %33 = tpu.matmul %30, %32, %cst_21 {dimension_numbers = #tpu.dot_dimension_numbers<[1], [0], [0], [1], [0, 0, 1, 1], [], []>} : vector<160x128xbf16>, vector<128x128xbf16>, vector<160x128xf32> -> vector<160x128xf32>
    %34 = arith.addf %29, %33 : vector<160x128xf32>
    %c0_22 = arith.constant 0 : index
    %c0_23 = arith.constant 0 : index
    %c0_24 = arith.constant 0 : index
    %35 = vector.load %arg4[%c0_22, %c0_23, %c0_24] : memref<4x1x128xf32, #tpu.memory_space<vmem>>, vector<1x1x128xf32>
    %36 = vector.shape_cast %35 : vector<1x1x128xf32> to vector<1x128xf32>
    %37 = vector.broadcast %36 : vector<1x128xf32> to vector<160x128xf32>
    %38 = arith.addf %34, %37 : vector<160x128xf32>
    %39 = vector.shape_cast %38 : vector<160x128xf32> to vector<10x16x128xf32>
    %40 = math.tanh %39 : vector<10x16x128xf32>
    %41 = arith.truncf %40 : vector<10x16x128xf32> to vector<10x16x128xbf16>
    %cst_25 = arith.constant 0.000000e+00 : bf16
    %42 = vector.broadcast %cst_25 : bf16 to vector<10x1x128xbf16>
    %43 = vector.extract_strided_slice %41 {offsets = [0, 0, 0], sizes = [10, 15, 128], strides = [1, 1, 1]} : vector<10x16x128xbf16> to vector<10x15x128xbf16>
    %44 = tpu.concatenate %42, %43 in 1 : vector<10x1x128xbf16>, vector<10x15x128xbf16> -> vector<10x16x128xbf16>
    %45 = vector.extract_strided_slice %41 {offsets = [0, 1, 0], sizes = [10, 15, 128], strides = [1, 1, 1]} : vector<10x16x128xbf16> to vector<10x15x128xbf16>
    %46 = tpu.concatenate %45, %42 in 1 : vector<10x15x128xbf16>, vector<10x1x128xbf16> -> vector<10x16x128xbf16>
    %47 = vector.shape_cast %44 : vector<10x16x128xbf16> to vector<160x128xbf16>
    %c1_26 = arith.constant 1 : index
    %c0_27 = arith.constant 0 : index
    %c0_28 = arith.constant 0 : index
    %c0_29 = arith.constant 0 : index
    %48 = vector.load %arg3[%c1_26, %c0_27, %c0_28, %c0_29] : memref<4x3x128x128xbf16, #tpu.memory_space<vmem>>, vector<1x1x128x128xbf16>
    %49 = vector.shape_cast %48 : vector<1x1x128x128xbf16> to vector<128x128xbf16>
    %cst_30 = arith.constant dense<0.000000e+00> : vector<160x128xf32>
    %50 = tpu.matmul %47, %49, %cst_30 {dimension_numbers = #tpu.dot_dimension_numbers<[1], [0], [0], [1], [0, 0, 1, 1], [], []>} : vector<160x128xbf16>, vector<128x128xbf16>, vector<160x128xf32> -> vector<160x128xf32>
    %51 = vector.shape_cast %41 : vector<10x16x128xbf16> to vector<160x128xbf16>
    %c1_31 = arith.constant 1 : index
    %c1_32 = arith.constant 1 : index
    %c0_33 = arith.constant 0 : index
    %c0_34 = arith.constant 0 : index
    %52 = vector.load %arg3[%c1_31, %c1_32, %c0_33, %c0_34] : memref<4x3x128x128xbf16, #tpu.memory_space<vmem>>, vector<1x1x128x128xbf16>
    %53 = vector.shape_cast %52 : vector<1x1x128x128xbf16> to vector<128x128xbf16>
    %cst_35 = arith.constant dense<0.000000e+00> : vector<160x128xf32>
    %54 = tpu.matmul %51, %53, %cst_35 {dimension_numbers = #tpu.dot_dimension_numbers<[1], [0], [0], [1], [0, 0, 1, 1], [], []>} : vector<160x128xbf16>, vector<128x128xbf16>, vector<160x128xf32> -> vector<160x128xf32>
    %55 = arith.addf %50, %54 : vector<160x128xf32>
    %56 = vector.shape_cast %46 : vector<10x16x128xbf16> to vector<160x128xbf16>
    %c1_36 = arith.constant 1 : index
    %c2_37 = arith.constant 2 : index
    %c0_38 = arith.constant 0 : index
    %c0_39 = arith.constant 0 : index
    %57 = vector.load %arg3[%c1_36, %c2_37, %c0_38, %c0_39] : memref<4x3x128x128xbf16, #tpu.memory_space<vmem>>, vector<1x1x128x128xbf16>
    %58 = vector.shape_cast %57 : vector<1x1x128x128xbf16> to vector<128x128xbf16>
    %cst_40 = arith.constant dense<0.000000e+00> : vector<160x128xf32>
    %59 = tpu.matmul %56, %58, %cst_40 {dimension_numbers = #tpu.dot_dimension_numbers<[1], [0], [0], [1], [0, 0, 1, 1], [], []>} : vector<160x128xbf16>, vector<128x128xbf16>, vector<160x128xf32> -> vector<160x128xf32>
    %60 = arith.addf %55, %59 : vector<160x128xf32>
    %c1_41 = arith.constant 1 : index
    %c0_42 = arith.constant 0 : index
    %c0_43 = arith.constant 0 : index
    %61 = vector.load %arg4[%c1_41, %c0_42, %c0_43] : memref<4x1x128xf32, #tpu.memory_space<vmem>>, vector<1x1x128xf32>
    %62 = vector.shape_cast %61 : vector<1x1x128xf32> to vector<1x128xf32>
    %63 = vector.broadcast %62 : vector<1x128xf32> to vector<160x128xf32>
    %64 = arith.addf %60, %63 : vector<160x128xf32>
    %65 = vector.shape_cast %64 : vector<160x128xf32> to vector<10x16x128xf32>
    %66 = math.tanh %65 : vector<10x16x128xf32>
    %67 = arith.truncf %66 : vector<10x16x128xf32> to vector<10x16x128xbf16>
    %68 = tpu.iota {dimensions = array<i32: 0>} : vector<10x1x1xi32>
    %c1_i32_44 = arith.constant 1 : i32
    %69 = arith.addi %8, %c1_i32_44 : i32
    %70 = vector.broadcast %69 : i32 to vector<10x1x1xi32>
    %71 = arith.addi %68, %70 : vector<10x1x1xi32>
    %c2_i32_45 = arith.constant 2 : i32
    %72 = vector.broadcast %c2_i32_45 : i32 to vector<10x1x1xi32>
    %73 = arith.cmpi sge, %71, %72 : vector<10x1x1xi32>
    %c18_i32 = arith.constant 18 : i32
    %74 = vector.broadcast %c18_i32 : i32 to vector<10x1x1xi32>
    %75 = arith.cmpi slt, %71, %74 : vector<10x1x1xi32>
    %76 = arith.andi %73, %75 : vector<10x1x1xi1>
    %cst_46 = arith.constant 0.000000e+00 : bf16
    %77 = vector.broadcast %cst_46 : bf16 to vector<10x16x128xbf16>
    %78 = vector.shape_cast %76 : vector<10x1x1xi1> to vector<10x1x1xi1>
    %79 = vector.broadcast %78 : vector<10x1x1xi1> to vector<10x16x128xi1>
    %80 = arith.select %79, %67, %77 : vector<10x16x128xi1>, vector<10x16x128xbf16>
    %81 = vector.extract_strided_slice %80 {offsets = [0, 0, 0], sizes = [8, 16, 128], strides = [1, 1, 1]} : vector<10x16x128xbf16> to vector<8x16x128xbf16>
    %82 = vector.extract_strided_slice %80 {offsets = [1, 0, 0], sizes = [8, 16, 128], strides = [1, 1, 1]} : vector<10x16x128xbf16> to vector<8x16x128xbf16>
    %83 = vector.extract_strided_slice %80 {offsets = [2, 0, 0], sizes = [8, 16, 128], strides = [1, 1, 1]} : vector<10x16x128xbf16> to vector<8x16x128xbf16>
    %84 = vector.shape_cast %81 : vector<8x16x128xbf16> to vector<128x128xbf16>
    %c2_47 = arith.constant 2 : index
    %c0_48 = arith.constant 0 : index
    %c0_49 = arith.constant 0 : index
    %c0_50 = arith.constant 0 : index
    %85 = vector.load %arg3[%c2_47, %c0_48, %c0_49, %c0_50] : memref<4x3x128x128xbf16, #tpu.memory_space<vmem>>, vector<1x1x128x128xbf16>
    %86 = vector.shape_cast %85 : vector<1x1x128x128xbf16> to vector<128x128xbf16>
    %cst_51 = arith.constant dense<0.000000e+00> : vector<128x128xf32>
    %87 = tpu.matmul %84, %86, %cst_51 {dimension_numbers = #tpu.dot_dimension_numbers<[1], [0], [0], [1], [0, 0, 1, 1], [], []>} : vector<128x128xbf16>, vector<128x128xbf16>, vector<128x128xf32> -> vector<128x128xf32>
    %88 = vector.shape_cast %82 : vector<8x16x128xbf16> to vector<128x128xbf16>
    %c2_52 = arith.constant 2 : index
    %c1_53 = arith.constant 1 : index
    %c0_54 = arith.constant 0 : index
    %c0_55 = arith.constant 0 : index
    %89 = vector.load %arg3[%c2_52, %c1_53, %c0_54, %c0_55] : memref<4x3x128x128xbf16, #tpu.memory_space<vmem>>, vector<1x1x128x128xbf16>
    %90 = vector.shape_cast %89 : vector<1x1x128x128xbf16> to vector<128x128xbf16>
    %cst_56 = arith.constant dense<0.000000e+00> : vector<128x128xf32>
    %91 = tpu.matmul %88, %90, %cst_56 {dimension_numbers = #tpu.dot_dimension_numbers<[1], [0], [0], [1], [0, 0, 1, 1], [], []>} : vector<128x128xbf16>, vector<128x128xbf16>, vector<128x128xf32> -> vector<128x128xf32>
    %92 = arith.addf %87, %91 : vector<128x128xf32>
    %93 = vector.shape_cast %83 : vector<8x16x128xbf16> to vector<128x128xbf16>
    %c2_57 = arith.constant 2 : index
    %c2_58 = arith.constant 2 : index
    %c0_59 = arith.constant 0 : index
    %c0_60 = arith.constant 0 : index
    %94 = vector.load %arg3[%c2_57, %c2_58, %c0_59, %c0_60] : memref<4x3x128x128xbf16, #tpu.memory_space<vmem>>, vector<1x1x128x128xbf16>
    %95 = vector.shape_cast %94 : vector<1x1x128x128xbf16> to vector<128x128xbf16>
    %cst_61 = arith.constant dense<0.000000e+00> : vector<128x128xf32>
    %96 = tpu.matmul %93, %95, %cst_61 {dimension_numbers = #tpu.dot_dimension_numbers<[1], [0], [0], [1], [0, 0, 1, 1], [], []>} : vector<128x128xbf16>, vector<128x128xbf16>, vector<128x128xf32> -> vector<128x128xf32>
    %97 = arith.addf %92, %96 : vector<128x128xf32>
    %c2_62 = arith.constant 2 : index
    %c0_63 = arith.constant 0 : index
    %c0_64 = arith.constant 0 : index
    %98 = vector.load %arg4[%c2_62, %c0_63, %c0_64] : memref<4x1x128xf32, #tpu.memory_space<vmem>>, vector<1x1x128xf32>
    %99 = vector.shape_cast %98 : vector<1x1x128xf32> to vector<1x128xf32>
    %100 = vector.broadcast %99 : vector<1x128xf32> to vector<128x128xf32>
    %101 = arith.addf %97, %100 : vector<128x128xf32>
    %102 = vector.shape_cast %101 : vector<128x128xf32> to vector<8x16x128xf32>
    %103 = math.tanh %102 : vector<8x16x128xf32>
    %104 = arith.truncf %103 : vector<8x16x128xf32> to vector<8x16x128xbf16>
    %cst_65 = arith.constant 0.000000e+00 : bf16
    %105 = vector.broadcast %cst_65 : bf16 to vector<8x1x128xbf16>
    %106 = vector.extract_strided_slice %104 {offsets = [0, 0, 0], sizes = [8, 15, 128], strides = [1, 1, 1]} : vector<8x16x128xbf16> to vector<8x15x128xbf16>
    %107 = tpu.concatenate %105, %106 in 1 : vector<8x1x128xbf16>, vector<8x15x128xbf16> -> vector<8x16x128xbf16>
    %108 = vector.extract_strided_slice %104 {offsets = [0, 1, 0], sizes = [8, 15, 128], strides = [1, 1, 1]} : vector<8x16x128xbf16> to vector<8x15x128xbf16>
    %109 = tpu.concatenate %108, %105 in 1 : vector<8x15x128xbf16>, vector<8x1x128xbf16> -> vector<8x16x128xbf16>
    %110 = vector.shape_cast %107 : vector<8x16x128xbf16> to vector<128x128xbf16>
    %c3 = arith.constant 3 : index
    %c0_66 = arith.constant 0 : index
    %c0_67 = arith.constant 0 : index
    %c0_68 = arith.constant 0 : index
    %111 = vector.load %arg3[%c3, %c0_66, %c0_67, %c0_68] : memref<4x3x128x128xbf16, #tpu.memory_space<vmem>>, vector<1x1x128x128xbf16>
    %112 = vector.shape_cast %111 : vector<1x1x128x128xbf16> to vector<128x128xbf16>
    %cst_69 = arith.constant dense<0.000000e+00> : vector<128x128xf32>
    %113 = tpu.matmul %110, %112, %cst_69 {dimension_numbers = #tpu.dot_dimension_numbers<[1], [0], [0], [1], [0, 0, 1, 1], [], []>} : vector<128x128xbf16>, vector<128x128xbf16>, vector<128x128xf32> -> vector<128x128xf32>
    %114 = vector.shape_cast %104 : vector<8x16x128xbf16> to vector<128x128xbf16>
    %c3_70 = arith.constant 3 : index
    %c1_71 = arith.constant 1 : index
    %c0_72 = arith.constant 0 : index
    %c0_73 = arith.constant 0 : index
    %115 = vector.load %arg3[%c3_70, %c1_71, %c0_72, %c0_73] : memref<4x3x128x128xbf16, #tpu.memory_space<vmem>>, vector<1x1x128x128xbf16>
    %116 = vector.shape_cast %115 : vector<1x1x128x128xbf16> to vector<128x128xbf16>
    %cst_74 = arith.constant dense<0.000000e+00> : vector<128x128xf32>
    %117 = tpu.matmul %114, %116, %cst_74 {dimension_numbers = #tpu.dot_dimension_numbers<[1], [0], [0], [1], [0, 0, 1, 1], [], []>} : vector<128x128xbf16>, vector<128x128xbf16>, vector<128x128xf32> -> vector<128x128xf32>
    %118 = arith.addf %113, %117 : vector<128x128xf32>
    %119 = vector.shape_cast %109 : vector<8x16x128xbf16> to vector<128x128xbf16>
    %c3_75 = arith.constant 3 : index
    %c2_76 = arith.constant 2 : index
    %c0_77 = arith.constant 0 : index
    %c0_78 = arith.constant 0 : index
    %120 = vector.load %arg3[%c3_75, %c2_76, %c0_77, %c0_78] : memref<4x3x128x128xbf16, #tpu.memory_space<vmem>>, vector<1x1x128x128xbf16>
    %121 = vector.shape_cast %120 : vector<1x1x128x128xbf16> to vector<128x128xbf16>
    %cst_79 = arith.constant dense<0.000000e+00> : vector<128x128xf32>
    %122 = tpu.matmul %119, %121, %cst_79 {dimension_numbers = #tpu.dot_dimension_numbers<[1], [0], [0], [1], [0, 0, 1, 1], [], []>} : vector<128x128xbf16>, vector<128x128xbf16>, vector<128x128xf32> -> vector<128x128xf32>
    %123 = arith.addf %118, %122 : vector<128x128xf32>
    %c3_80 = arith.constant 3 : index
    %c0_81 = arith.constant 0 : index
    %c0_82 = arith.constant 0 : index
    %124 = vector.load %arg4[%c3_80, %c0_81, %c0_82] : memref<4x1x128xf32, #tpu.memory_space<vmem>>, vector<1x1x128xf32>
    %125 = vector.shape_cast %124 : vector<1x1x128xf32> to vector<1x128xf32>
    %126 = vector.broadcast %125 : vector<1x128xf32> to vector<128x128xf32>
    %127 = arith.addf %123, %126 : vector<128x128xf32>
    %128 = vector.shape_cast %127 : vector<128x128xf32> to vector<8x16x128xf32>
    %129 = vector.extract_strided_slice %17 {offsets = [2, 0, 0], sizes = [8, 16, 128], strides = [1, 1, 1]} : vector<12x16x128xbf16> to vector<8x16x128xbf16>
    %130 = arith.extf %129 : vector<8x16x128xbf16> to vector<8x16x128xf32>
    %131 = arith.addf %128, %130 : vector<8x16x128xf32>
    %132 = math.tanh %131 : vector<8x16x128xf32>
    %c0_83 = arith.constant 0 : index
    %c0_84 = arith.constant 0 : index
    %c0_85 = arith.constant 0 : index
    %c0_86 = arith.constant 0 : index
    %133 = vector.load %arg5[%c0_83, %c0_84, %c0_85, %c0_86] : memref<1x8x16x128xf32, #tpu.memory_space<vmem>>, vector<1x8x16x128xf32>
    %134 = vector.shape_cast %133 : vector<1x8x16x128xf32> to vector<8x16x128xf32>
    %135 = vector.shape_cast %132 : vector<8x16x128xf32> to vector<1x8x16x128xf32>
    tpu.vector_store %arg5[%c0_83, %c0_84, %c0_85, %c0_86], %135 {strides = array<i32>} : memref<1x8x16x128xf32, #tpu.memory_space<vmem>>, vector<1x8x16x128xf32>,
    return
  }
  func.func @transform_1(%arg0: i32, %arg1: i32) -> (i32, i32, i32, i32) {
    %c0_i32 = arith.constant 0 : i32
    %c0_i32_0 = arith.constant 0 : i32
    %c0_i32_1 = arith.constant 0 : i32
    %c0_i32_2 = arith.constant 0 : i32
    %c0_i32_3 = arith.constant 0 : i32
    return %c0_i32, %c0_i32_0, %c0_i32_1, %c0_i32_2 : i32, i32, i32, i32
  }
  func.func @transform_2(%arg0: i32, %arg1: i32) -> (i32, i32, i32) {
    %c0_i32 = arith.constant 0 : i32
    %c0_i32_0 = arith.constant 0 : i32
    %c0_i32_1 = arith.constant 0 : i32
    %c0_i32_2 = arith.constant 0 : i32
    return %c0_i32, %c0_i32_0, %c0_i32_1 : i32, i32, i32
  }
  func.func @transform_3(%arg0: i32, %arg1: i32) -> (i32, i32, i32, i32) {
    %c0_i32 = arith.constant 0 : i32
    %c0_i32_0 = arith.constant 0 : i32
    %c0_i32_1 = arith.constant 0 : i32
    return %arg0, %arg1, %c0_i32, %c0_i32_0 : i32, i32, i32, i32
  }
}

</mosaic_0001>

<bundles_post_ra>
// kernel: tpu_custom_call.1
= control target key start
LH: loop header
LB: loop body
LE: loop exit
PB: predicated region body
PF: predicated region fallthrough
CT: control target
= control target key end

     0   :  { %s5366_s0 = inlined_call_operand.hbm [shape: bf16[2,20,16,128], index: 0, kind: input, shape index: {}]   ;;  %s5367_s1 = inlined_call_operand.hbm [shape: bf16[4,3,128,128], index: 1, kind: input, shape index: {}]   ;;  %s5368_s2 = inlined_call_operand.hbm [shape: f32[4,1,128], index: 2, kind: input, shape index: {}]   ;;  %s5369_s3 = inlined_call_operand.hbm [shape: f32[2,16,16,128], index: 3, kind: output, shape index: {}]  }
   0x1   :  { %5377 = sst [smem:[#allocation23_spill]] %s5367_s1 }
   0x2   :  { %5378 = sst [smem:[#allocation24_spill]] %s5368_s2 }
   0x3   :  { %8 = vsyncpa [#allocation5], 0 }
   0x4   :  { %9 = vsyncpa [#allocation8], 0 }
   0x5   :  { %10 = vsyncpa [#allocation6], 0 }
   0x6   :  { %12 = vsyncpa [#allocation6 + $0x1], 0  ;;  %s4522_s12 = smov 0   ;;  %s4524_s13 = smov 0  }
   0x7   :  { %s4526_s14 = smov 0   ;;  %s4528_s15 = smov 0  }
   0x8   :  { %s4530_s16 = smov 0   ;;  %s4532_s17 = smov 0  }
   0x9   :  { %s4534_s18 = smov 0   ;;  %s4536_s19 = smov 0  }
   0xa LB: > { %5379 = sst [smem:[#allocation20_spill]] %s4486_s18  ;;  %s3130_s20 = sadd.s32 4294967295, %s4490_s19   ;;  %s4490_s19 = sphi %s4536_s19, %s18_s19   ;;  %s4486_s18 = sphi %s4534_s18, %s5417_s18   ;;  %s4482_s17 = sphi %s4532_s17, %s5422_s17   ;;  %s4478_s16 = sphi %s4530_s16, %s5415_s16   ;;  %s4474_s15 = sphi %s4528_s15, %s5421_s15   ;;  %s4470_s14 = sphi %s4526_s14, %s5420_s14   ;;  %s4466_s13 = sphi %s4524_s13, %s5419_s13   ;;  %s4462_s12 = sphi %s4522_s12, %s5418_s12  }
   0xb   : > { %s3131_s21 = sadd.s32 4294967294, %s4490_s19   ;;  %s27_s22 = sadd.s32 1, %s4482_s17 }
   0xc   : > { %s30_s23 = sadd.s32 1, %s4486_s18  ;;  %p28_p0 = scmp.ge.s32.totalorder %s27_s22, 2 }
   0xd   : > { %s81_s24 = sadd.s32 1, %s4470_s14  ;;  %p91_p1 = scmp.ne.s32.totalorder %s4470_s14, %s4466_s13 }
   0xe   : > { %p92_p2 = scmp.eq.s32.totalorder %s3130_s20, 3  ;;  %s5424_s22 = smov (%p28_p0, %s27_s22), 0 }
   0xf   : > { %5380 = sst [smem:[#allocation21_spill]] %s5424_s22  ;;  %s5426_s23 = smov (!%p28_p0, %s30_s23), %s4486_s18 }
  0x10   : > { %s77_s25 = ssub.s32 %s4482_s17, %s5424_s22  ;;  %p4574_p3 = por %p92_p2, %p91_p1 }
  0x11   : > { %p32_p4 = scmp.ge.s32.totalorder %s5426_s23, 2  ;;  %p97_p5 = scmp.ne.s32.totalorder %s4466_s13, %s4462_s12 }
  0x12   : > { %p98_p6 = scmp.eq.s32.totalorder %s3131_s21, 3  ;;  %p3132_p7 = scmp.ge.s32.totalorder %s4490_s19, 1 }
  0x13   : > { %s5428_s23 = smov (%p32_p4, %s5426_s23), 0  ;;  %p105_p9 = scmp.lt.s32.totalorder %s4490_s19, 5 }
  0x14   : > { %5382 = sst [smem:[#allocation22_spill]] %s5428_s23  ;;  %p4583_p8 = por %p98_p6, %p97_p5 }
  0x15   : > { %s76_s28 = ssub.s32 %s4486_s18, %s5428_s23  ;;  %p4590_p10 = pnand %p3132_p7, %p105_p9 }
  0x16   : > { %s5383_s27 = scalar_select %p4583_p8, 1, 0 }
  0x17   : > { %s78_s29 = sor.u32 %s77_s25, %s76_s28  ;;  %p4594_p12 = scmp.eq.s32.totalorder %s3130_s20, 0 }
  0x18   : > { %p79_p11 = scmp.eq.s32.totalorder %s78_s29, 0  ;;  %p3924_p13 = pneg %p4590_p10 }
  0x19   : > { %s4492_s6 = smov [#allocation4]  }
  0x1a   : > { %s4601_s5 = scalar_select %p79_p11, %s4470_s14, %s81_s24  }
  0x1b   : > { %s117_s7 = sshll.u32 %s4492_s6, 4  ;;  %p4605_p0 = pnand %p4594_p12, %p3924_p13  ;;  %s118_s7 = int_to_ptr.vmem [resolvable:$true] %s117_s7 }
  0x1c   : > { %s4294_s9 = scalar_lea.vmem %s118_s7, 12288  ;;  %p4302_p6 = scmp.lt.s32.totalorder %s118_s7, %s118_s7 }
  0x1d   : > { %p4285_p1 = pneg %p4605_p0  ;;  %p4295_p2 = scmp.ne.s32.totalorder %s118_s7, %s4294_s9 }
  0x1e   : > { %p4303_p7 = scmp.lt.s32.totalorder %s4294_s9, %s4294_s9 }
  0x1f   : > { %p4297_p4 = pnand %p4295_p2, %p4285_p1 }
  0x20   : > { %p4304_p9 = por %p4303_p7, %p4302_p6 }
  0x21   : > { %p4298_p5 = pneg %p4297_p4 }
  0x23   : > { %p4305_p11 = pnand %p4304_p9, %p4298_p5 }
  0x25   : > { %4308 = shalt.err (!%p4305_p11)
}
  0x26   : > { %s4493_s10 = smov 64   ;;  %s4494_s11 = smov 4  }
  0x27   : > { %s5387_s1 = sld [smem:[#allocation23_spill]]  ;;  %s4495_s24 = smov [#allocation7]  }
  0x28   : > { %s130_s25 = sshll.u32 %s4495_s24, 4  ;;  %s131_s25 = int_to_ptr.vmem [resolvable:$true] %s130_s25 }
  0x29   : > { %s4320_s28 = scalar_lea.vmem %s131_s25, 64  ;;  %p4328_p5 = scmp.lt.s32.totalorder %s131_s25, %s131_s25 }
  0x2a   : > { %p4321_p13 = scmp.ne.s32.totalorder %s131_s25, %s4320_s28  ;;  %p4329_p6 = scmp.lt.s32.totalorder %s4320_s28, %s4320_s28 }
  0x2c   : > { %p4323_p2 = pnand %p4321_p13, %p4285_p1  ;;  %p4330_p7 = por %p4329_p6, %p4328_p5 }
  0x2d   : > { %3927 = dma.hbm_to_vmem [thread:$0]  (!%p4605_p0), %s5387_s1, 12288, %s118_s7, [#allocation5], %s4493_s10, %s4493_s10, %s4494_s11  }
  0x2e   : > { %p4324_p4 = pneg %p4323_p2 }
  0x30   : > { %p4331_p9 = pnand %p4330_p7, %p4324_p4 }
  0x32   : > { %4334 = shalt.err (!%p4331_p9)
}
  0x33   : > { %s4496_s29 = smov 16   ;;  %s4497_s6 = smov 1  }
  0x34   : > { %s5388_s2 = sld [smem:[#allocation24_spill]] }
  0x36   : > { %146 = sbr.rel (%p4590_p10) target bundleno = 1221 (0x4c5), region = 28 }
  0x3a   : > { %3930 = dma.hbm_to_vmem [thread:$0]  (!%p4605_p0), %s5388_s2, 64, %s131_s25, [#allocation8], %s4496_s29, %s4496_s29, %s4497_s6  }
  0x3b   : > { %4447 = dma.done.wait (%p4594_p12), [#allocation5], 12288  }
  0x3c   : > { %4449 = vsyncadd (%p4594_p12), [#allocation5], 4294955008 }
  0x3d   : > { %4451 = dma.done.wait (%p4594_p12), [#allocation8], 64  }
  0x3e   : > { %4453 = vsyncadd (%p4594_p12), [#allocation8], 4294967232  ;;  %s5370_s30 = sand.u32 1, %s4466_s13   ;;  %p3939_p10 = scmp.eq.s32.totalorder %s4474_s15, 0 }
  0x3f   : > { %s4640_s8 = sshll.u32 %s5370_s30, 7  ;;  %s5371_s10 = sshll.u32 %s4474_s15, 4 }
  0x40   : > { %s175_s11 = smul.u32 40, %s4478_s16  ;;  %s4498_s20 = smov [#allocation2]  }
  0x41   : > { %s186_s21 = sshll.u32 %s4498_s20, 4  ;;  %s190_s24 = sadd.s32 1, %s4474_s15  ;;  %s4648_s21 = int_to_ptr.vmem [resolvable:$true] %s186_s21 }
  0x42   : > { %s176_s4 = sadd.s32 %s5371_s10, %s175_s11  ;;  %p4655_p12 = scmp.lt.s32.totalorder %s190_s24, 2 }
  0x43   : > { %s3142_s25 = sshll.u32 %s176_s4, 6  ;;  %s5373_s4 = scalar_lea.hbm %s5366_s0, 5120 }
  0x44   : > { %s4653_s6 = scalar_lea.hbm %s5366_s0, %s3142_s25 }
  0x45   : > { %s4335_s7 = scalar_lea.hbm %s4653_s6, 1536  ;;  %p4340_p13 = scmp.lt.s32.totalorder %s4653_s6, %s5366_s0 }
  0x46   : > { %p4336_p0 = scmp.ne.s32.totalorder %s4653_s6, %s4335_s7  ;;  %p4341_p2 = scmp.lt.s32.totalorder %s5373_s4, %s4335_s7 }
  0x48   : > { %p4337_p1 = pnand %p4336_p0, %p3939_p10  ;;  %p4342_p4 = por %p4341_p2, %p4340_p13 }
  0x4a   : > { %p4338_p11 = pneg %p4337_p1 }
  0x4c   : > { %p4343_p5 = pnand %p4342_p4, %p4338_p11 }
  0x4e   : > { %4346 = shalt.err (!%p4343_p5)  }
  0x4f   : > { %s4347_s11 = scalar_lea.vmem %s4648_s21, 1536  ;;  %s5372_s30 = scalar_lea.vmem %s4648_s21, 3072 }
  0x50   : > { %p4348_p6 = scmp.ne.s32.totalorder %s4648_s21, %s4347_s11  ;;  %p4354_p0 = scmp.lt.s32.totalorder %s4648_s21, %s4648_s21 }
  0x51   : > { %p4355_p1 = scmp.lt.s32.totalorder %s5372_s30, %s4347_s11 }
  0x52   : > { %p4349_p7 = pnand %p4348_p6, %p3939_p10 }
  0x53   : > { %p4356_p8 = por %p4355_p1, %p4354_p0 }
  0x54   : > { %p4350_p9 = pneg %p4349_p7 }
  0x56   : > { %p4357_p13 = pnand %p4356_p8, %p4350_p9 }
  0x58   : > { %4360 = shalt.err (!%p4357_p13)  }
  0x59   : > { %3919 = dma.hbm_to_vmem [thread:$0]  (%p3939_p10), %s4653_s6, 1536, %s4648_s21, [#allocation3] }
  0x5a   : > { %s4688_s7 = scalar_lea.hbm %s4653_s6, 1024  ;;  %s4690_s20 = sand.u32 1, %s190_s24 }
  0x5b   : > { %s3295_s28 = smul.u32 96, %s4690_s20  ;;  %s217_s25 = sand.u32 1, %s4474_s15 }
  0x5c   : > { %s3147_s29 = sshll.u32 %s4474_s15, 3  ;;  %s3296_s11 = smul.u32 96, %s217_s25 }
  0x5d   : > { %s204_s10 = scalar_lea.vmem [#allocation2], %s3295_s28  ;;  %s205_s4 = scalar_lea.sflag [#allocation3], %s4690_s20 }
  0x5e   : > { %s213_s30 = sshll.u32 %s204_s10, 4  ;;  %s4387_s1 = scalar_lea.hbm %s4653_s6, 2560  ;;  %s214_s30 = int_to_ptr.vmem [resolvable:$true] %s213_s30 }
  0x5f   : > { %p4362_p8 = scmp.ne.s32.totalorder %s4688_s7, %s4387_s1  ;;  %p4366_p2 = scmp.lt.s32.totalorder %s4688_s7, %s5366_s0 }
  0x60   : > { %s5390_s18 = scalar_lea.hbm %s5366_s0, 5120 }
  0x61   : > { %p4363_p10 = pnand %p4362_p8, %p4655_p12  ;;  %p4367_p4 = scmp.lt.s32.totalorder %s5390_s18, %s4387_s1 }
  0x63   : > { %p4364_p11 = pneg %p4363_p10  ;;  %p4368_p5 = por %p4367_p4, %p4366_p2 }
  0x65   : > { %p4369_p6 = pnand %p4368_p5, %p4364_p11 }
  0x67   : > { %4372 = shalt.err (!%p4369_p6)  }
  0x68   : > { %s4373_s10 = scalar_lea.vmem %s214_s30, 1536  ;;  %p4380_p1 = scmp.lt.s32.totalorder %s214_s30, %s4648_s21 }
  0x69   : > { %p4374_p7 = scmp.ne.s32.totalorder %s214_s30, %s4373_s10  ;;  %s5391_s6 = scalar_lea.vmem %s4648_s21, 3072 }
  0x6a   : > { %p4381_p13 = scmp.lt.s32.totalorder %s5391_s6, %s4373_s10 }
  0x6b   : > { %p4375_p9 = pnand %p4374_p7, %p4655_p12 }
  0x6c   : > { %p4382_p8 = por %p4381_p13, %p4380_p1 }
  0x6d   : > { %p4376_p0 = pneg %p4375_p9 }
  0x6f   : > { %p4383_p10 = pnand %p4382_p8, %p4376_p0 }
  0x71   : > { %4386 = shalt.err (!%p4383_p10)  }
  0x72   : > { %3921 = dma.hbm_to_vmem [thread:$0]  (%p4655_p12), %s4688_s7, 1536, %s214_s30, %s205_s4 }
  0x73   : > { %s4717_s1 = scalar_lea.vmem [#allocation9], %s4640_s8  ;;  %s4719_s2 = scalar_lea.vmem [#allocation2], %s3296_s11 }
  0x74   : > { %s222_s18 = scalar_lea.sflag [#allocation3], %s217_s25 }
  0x75   : > { %4454 = dma.done.wait %s222_s18, 1536 }
  0x76   : > { %4455 = vsyncadd %s222_s18, 4294965760  ;;  %v4015_v0 = vld [vmem:[#allocation4 + $0x78] sm:$0xff]   ;;  %v4017_v2 = vld [vmem:[#allocation4 + $0x70] sm:$0xff]   ;;  %vm1014_vm0 = vcmask 1040384   ;;  %vm1015_vm1 = vsmask.f32 256 }
  0x77   : > { %v4016_v1 = vld [vmem:[#allocation4 + $0x38] sm:$0xff]   ;;  %3502 = vmatprep.subr.bf16.mxu0 %v4015_v0  ;;  %v4018_v3 = vld [vmem:[#allocation4 + $0x30] sm:$0xff]   ;;  %v4019_v4 = vld [vmem:[#allocation4 + $0x68] sm:$0xff]   ;;  %vm1057_vm3 = vcmask 1047552   ;;  %vm1058_vm4 = vsmask.f32 7424 }
  0x78   : > { %3538 = vmatprep.subr.bf16.mxu1 %v4016_v1  ;;  %3503 = vmatpush3.bf16.msra.mxu0 %v4015_v0  ;;  %v4020_v5 = vld [vmem:[#allocation4 + $0x28] sm:$0xff]   ;;  %v4021_v6 = vld [vmem:[#allocation4 + $0x60] sm:$0xff]   ;;  %v4023_v8 = vld [vmem:[#allocation4 + $0x58] sm:$0xff]   ;;  %s1682_s22 = sadd.s32 1, %s3147_s29  ;;  %s3288_s23 = sshll.u32 %s4478_s16, 5 }
  0x79   : > { %3539 = vmatpush3.bf16.msra.mxu1 %v4016_v1  ;;  %3504 = vmatprep.subr.bf16.mxu0 %v4017_v2  ;;  %v4022_v7 = vld [vmem:[#allocation4 + $0x20] sm:$0xff]   ;;  %v4024_v9 = vld [vmem:[#allocation4 + $0x18] sm:$0xff]   ;;  %v4025_v10 = vld [vmem:[#allocation4 + $0x50] sm:$0xff]   ;;  %s5412_s8 = sshll.u32 %s4474_s15, 4  ;;  %s3014_s4 = sshll.u32 %s4717_s1, 4  ;;  %s5309_s4 = int_to_ptr.vmem [resolvable:$true] %s3014_s4 }
  0x7a   : > { %3540 = vmatprep.subr.bf16.mxu1 %v4018_v3  ;;  %v4026_v11 = vld [vmem:[#allocation4 + $0x10] sm:$0xff]   ;;  %v4031_v12 = vld [vmem:[%s4719_s2 + $0x8] sm:$0xff]   ;;  %v4032_v13 = vld [vmem:[%s4719_s2] sm:$0xff]   ;;  %s3011_s21 = sadd.s32 %s5412_s8, %s3288_s23  ;;  %s5413_s15 = sand.u32 1, %s4466_s13  }
  0x7b   : > { %3518 = vmatprep.mubr.bf16.mxu0 %v4031_v12  ;;  %3554 = vmatprep.mubr.bf16.mxu1 %v4032_v13  ;;  %v4027_v14 = vld [vmem:[#allocation4 + $0x48] sm:$0xff]   ;;  %v4029_v16 = vld [vmem:[#allocation4 + $0x40] sm:$0xff]   ;;  %v232_v18 = vld [vmem:[%s4719_s2 + $0x10] sm:$0xff]   ;;  %s3289_s9 = sshll.u32 %s3011_s21, 7  ;;  %s5315_s20 = scalar_lea.sflag [#allocation6], %s5413_s15 }
  0x7c   : > { %3505 = vmatpush3.bf16.msra.mxu0 %v4017_v2  ;;  %v4028_v15 = vld [vmem:[#allocation4 + $0x8] sm:$0xff]   ;;  %v4030_v17 = vld [vmem:[#allocation4] sm:$0xff]   ;;  %v4034_v19 = vld [vmem:[#allocation4 + $0xb8] sm:$0xff]   ;;  %s5307_s16 = scalar_lea.hbm %s5369_s3, %s3289_s9  ;;  %s4388_s28 = scalar_lea.vmem %s5309_s4, 2048 }
  0x7d   : > { %3541 = vmatpush3.bf16.msra.mxu1 %v4018_v3  ;;  %3506 = vmatprep.subr.bf16.mxu0 %v4019_v4  ;;  %v234_v20 = vld [vmem:[%s4719_s2 + $0x18] sm:$0xff]   ;;  %v4035_v21 = vld [vmem:[#allocation4 + $0xb0] sm:$0xff]   ;;  %v236_v22 = vld [vmem:[%s4719_s2 + $0x20] sm:$0xff]   ;;  %p4389_p12 = scmp.ne.s32.totalorder %s5309_s4, %s4388_s28  ;;  %s4499_s25 = smov [#allocation9]  }
  0x7e   : > { %3542 = vmatprep.subr.bf16.mxu1 %v4020_v5  ;;  %v4038_v23 = vld [vmem:[#allocation4 + $0xa8] sm:$0xff]   ;;  %v4040_v25 = vld [vmem:[#allocation4 + $0xa0] sm:$0xff]   ;;  %v240_v26 = vld [vmem:[%s4719_s2 + $0x30] sm:$0xff]   ;;  %s4392_s29 = sshll.u32 %s4499_s25, 4  ;;  %s4393_s29 = int_to_ptr.vmem [resolvable:$false] %s4392_s29 }
  0x7f   : > { %v238_v24 = vld [vmem:[%s4719_s2 + $0x28] sm:$0xff]   ;;  %v4042_v27 = vld [vmem:[#allocation4 + $0x98] sm:$0xff]   ;;  %v4045_v29 = vld [vmem:[#allocation4 + $0x90] sm:$0xff]   ;;  %p4390_p11 = pnand %p4389_p12, %p4574_p3  ;;  %s4394_s11 = scalar_lea.vmem %s4393_s29, 4096 }
  0x80   : > { %3507 = vmatpush3.bf16.msra.mxu0 %v4019_v4  ;;  %v242_v28 = vld [vmem:[%s4719_s2 + $0x38] sm:$0xff]   ;;  %v244_v30 = vld [vmem:[%s4719_s2 + $0x40] sm:$0xff]   ;;  %v4046_v31 = vld [vmem:[#allocation4 + $0x88] sm:$0xff]   ;;  %p4395_p4 = scmp.lt.s32.totalorder %s5309_s4, %s4393_s29  ;;  %p4396_p5 = scmp.lt.s32.totalorder %s4394_s11, %s4388_s28 }
  0x81   : > { %3543 = vmatpush3.bf16.msra.mxu1 %v4020_v5  ;;  %3508 = vmatprep.subr.bf16.mxu0 %v4021_v6  ;;  %v246_v32 = vld [vmem:[%s4719_s2 + $0x48] sm:$0xff]   ;;  %v4049_v33 = vld [vmem:[#allocation4 + $0x80] sm:$0xff]   ;;  %v4048_v34 = vld [vmem:[%s4719_s2 + $0x50] sm:$0xff]   ;;  %p4391_p2 = pneg %p4390_p11 }
  0x82   : > { %3544 = vmatprep.subr.bf16.mxu1 %v4022_v7  ;;  %v4050_v35 = vld [vmem:[%s4719_s2 + $0x58] sm:$0xff]   ;;  %v4052_v37 = vld [vmem:[#allocation4 + $0x130] sm:$0xff]   ;;  %v4053_v38 = vld [vmem:[#allocation4 + $0x128] sm:$0xff]   ;;  %p4397_p6 = por %p4396_p5, %p4395_p4 }
  0x83   : > { %v4051_v36 = vld [vmem:[#allocation4 + $0x138] sm:$0xff]   ;;  %v4056_v40 = vld [vmem:[#allocation4 + $0xf0] sm:$0xff]   ;;  %v4054_v41 = vld [vmem:[#allocation4 + $0x120] sm:$0xff]  }
  0x84   : > { %3509 = vmatpush3.bf16.msra.mxu0 %v4021_v6  ;;  %v4055_v39 = vld [vmem:[#allocation4 + $0xf8] sm:$0xff]   ;;  %v4058_v42 = vld [vmem:[#allocation4 + $0xe8] sm:$0xff]   ;;  %v4060_v44 = vld [vmem:[#allocation4 + $0xe0] sm:$0xff]   ;;  %p4398_p7 = pnand %p4397_p6, %p4391_p2 }
  0x85   : > { %3545 = vmatpush3.bf16.msra.mxu1 %v4022_v7  ;;  %3510 = vmatprep.subr.bf16.mxu0 %v4023_v8  ;;  %v4057_v43 = vld [vmem:[#allocation4 + $0x118] sm:$0xff]   ;;  %v4059_v45 = vld [vmem:[#allocation4 + $0x110] sm:$0xff]   ;;  %v4061_v47 = vld [vmem:[#allocation4 + $0x108] sm:$0xff]  }
  0x86   : > { %3546 = vmatprep.subr.bf16.mxu1 %v4024_v9  ;;  %v4062_v46 = vld [vmem:[#allocation4 + $0xd8] sm:$0xff]   ;;  %v4064_v48 = vld [vmem:[#allocation4 + $0xd0] sm:$0xff]   ;;  %v4063_v49 = vld [vmem:[#allocation4 + $0x100] sm:$0xff]  }
  0x87   : > { %v4065_v50 = vld [vmem:[#allocation4 + $0xc8] sm:$0xff]   ;;  %v4067_v51 = vld [vmem:[#allocation4 + $0xc0] sm:$0xff]   ;;  %v4733_v52 = vld [vmem:[#allocation4 + $0x178] sm:$0xff]  }
  0x88   : > { %3511 = vmatpush3.bf16.msra.mxu0 %v4023_v8  ;;  %vm4801_vm2 = vmand %vm1014_vm0, %vm1015_vm1 }
  0x89   : > { %3547 = vmatpush3.bf16.msra.mxu1 %v4024_v9  ;;  %3512 = vmatprep.subr.bf16.mxu0 %v4025_v10  ;;  %vm4886_vm5 = vmand %vm1057_vm3, %vm1058_vm4 }
  0x8a   : > { %3548 = vmatprep.subr.bf16.mxu1 %v4026_v11 }
  0x8c   : > { %3513 = vmatpush3.bf16.msra.mxu0 %v4025_v10 }
  0x8d   : > { %3549 = vmatpush3.bf16.msra.mxu1 %v4026_v11  ;;  %3514 = vmatprep.subr.bf16.mxu0 %v4027_v14 }
  0x8e   : > { %3550 = vmatprep.subr.bf16.mxu1 %v4028_v15 }
  0x90   : > { %3515 = vmatpush3.bf16.msra.mxu0 %v4027_v14 }
  0x91   : > { %3551 = vmatpush3.bf16.msra.mxu1 %v4028_v15  ;;  %3516 = vmatprep.subr.bf16.mxu0 %v4029_v16 }
  0x92   : > { %3552 = vmatprep.subr.bf16.mxu1 %v4030_v17 }
  0x94   : > { %3517 = vmatpush3.bf16.msra.mxu0 %v4029_v16 }
  0x95   : > { %3553 = vmatpush3.bf16.msra.mxu1 %v4030_v17  ;;  %3574 = vmatprep.subr.bf16.mxu0 %v4034_v19 }
  0x96   : > { %3610 = vmatprep.subr.bf16.mxu1 %v4051_v36 }
  0x97   : > { %3519 = vmatmul.mubr.bf16.vlgmr.msra.gmra.mxu0 %v232_v18 }
  0x98   : > { %3555 = vmatmul.mubr.bf16.vlgmr.msra.gmra.mxu1 %v4031_v12  ;;  %3575 = vmatpush3.bf16.msra.mxu0 %v4034_v19 }
  0x99   : > { %3576 = vmatprep.subr.bf16.mxu0 %v4035_v21  ;;  %3522 = vmatprep.mubr.bf16.mxu0 %v234_v20 }
  0x9a   : > { %3558 = vmatprep.mubr.bf16.mxu1 %v232_v18  ;;  %3611 = vmatpush3.bf16.msra.mxu1 %v4051_v36 }
  0x9b   : > { %3612 = vmatprep.subr.bf16.mxu1 %v4052_v37 }
  0x9c   : > { %3577 = vmatpush3.bf16.msra.mxu0 %v4035_v21 }
  0x9d   : > { %3578 = vmatprep.subr.bf16.mxu0 %v4038_v23 }
  0x9e   : > { %3613 = vmatpush3.bf16.msra.mxu1 %v4052_v37 }
  0x9f   : > { %3523 = vmatmul.mubr.bf16.gmra.mxu0 %v236_v22  ;;  %3614 = vmatprep.subr.bf16.mxu1 %v4053_v38 }
  0xa0   : > { %3559 = vmatmul.mubr.bf16.gmra.mxu1 %v234_v20  ;;  %3579 = vmatpush3.bf16.msra.mxu0 %v4038_v23 }
  0xa1   : > { %3526 = vmatprep.mubr.bf16.mxu0 %v238_v24  ;;  %3562 = vmatprep.mubr.bf16.mxu1 %v236_v22 }
  0xa2   : > { %3580 = vmatprep.subr.bf16.mxu0 %v4040_v25  ;;  %3615 = vmatpush3.bf16.msra.mxu1 %v4053_v38 }
  0xa3   : > { %3616 = vmatprep.subr.bf16.mxu1 %v4054_v41 }
  0xa4   : > { %3581 = vmatpush3.bf16.msra.mxu0 %v4040_v25 }
  0xa5   : > { %3582 = vmatprep.subr.bf16.mxu0 %v4042_v27 }
  0xa6   : > { %3617 = vmatpush3.bf16.msra.mxu1 %v4054_v41 }
  0xa7   : > { %3527 = vmatmul.mubr.bf16.gmra.mxu0 %v240_v26  ;;  %3618 = vmatprep.subr.bf16.mxu1 %v4057_v43 }
  0xa8   : > { %3563 = vmatmul.mubr.bf16.gmra.mxu1 %v238_v24  ;;  %3583 = vmatpush3.bf16.msra.mxu0 %v4042_v27 }
  0xa9   : > { %3530 = vmatprep.mubr.bf16.mxu0 %v242_v28  ;;  %3566 = vmatprep.mubr.bf16.mxu1 %v240_v26 }
  0xaa   : > { %3584 = vmatprep.subr.bf16.mxu0 %v4045_v29  ;;  %3619 = vmatpush3.bf16.msra.mxu1 %v4057_v43 }
  0xab   : > { %3620 = vmatprep.subr.bf16.mxu1 %v4059_v45 }
  0xac   : > { %3585 = vmatpush3.bf16.msra.mxu0 %v4045_v29 }
  0xad   : > { %3586 = vmatprep.subr.bf16.mxu0 %v4046_v31 }
  0xae   : > { %3621 = vmatpush3.bf16.msra.mxu1 %v4059_v45 }
  0xaf   : > { %3531 = vmatmul.mubr.bf16.gmra.mxu0 %v244_v30  ;;  %3622 = vmatprep.subr.bf16.mxu1 %v4061_v47 }
  0xb0   : > { %3567 = vmatmul.mubr.bf16.gmra.mxu1 %v242_v28  ;;  %3534 = vmatprep.mubr.bf16.mxu0 %v246_v32 }
  0xb1   : > { %3570 = vmatprep.mubr.bf16.mxu1 %v244_v30  ;;  %3587 = vmatpush3.bf16.msra.mxu0 %v4046_v31 }
  0xb2   : > { %3588 = vmatprep.subr.bf16.mxu0 %v4049_v33  ;;  %3623 = vmatpush3.bf16.msra.mxu1 %v4061_v47 }
  0xb3   : > { %3624 = vmatprep.subr.bf16.mxu1 %v4063_v49 }
  0xb5   : > { %3589 = vmatpush3.bf16.msra.mxu0 %v4049_v33 }
  0xb6   : > { %3646 = vmatprep.subr.bf16.mxu0 %v4055_v39  ;;  %3625 = vmatpush3.bf16.msra.mxu1 %v4063_v49 }
  0xb7   : > { %3535 = vmatmul.mubr.bf16.gmra.mxu0 %v4048_v34  ;;  %3682 = vmatprep.subr.bf16.mxu1 %v4733_v52 }
  0xb8   : > { %3571 = vmatmul.mubr.bf16.gmra.mxu1 %v246_v32  ;;  %3590 = vmatprep.mubr.bf16.mxu0 %v232_v18 }
  0xbf   : > { %3591 = vmatmul.mubr.bf16.vlgmr.msra.gmra.mxu0 %v234_v20 }
  0xc0   : > { %3594 = vmatprep.mubr.bf16.mxu0 %v236_v22  ;;  %3647 = vmatpush3.bf16.msra.mxu0 %v4055_v39 }
  0xc1   : > { %3648 = vmatprep.subr.bf16.mxu0 %v4056_v40 }
  0xc4   : > { %3649 = vmatpush3.bf16.msra.mxu0 %v4056_v40 }
  0xc5   : > { %3650 = vmatprep.subr.bf16.mxu0 %v4058_v42 }
  0xc7   : > { %3595 = vmatmul.mubr.bf16.gmra.mxu0 %v238_v24  ;;  %v4756_v24 = vld [vmem:[#allocation7] ss:$0 sm:$0xff] }
  0xc8   : > { %3598 = vmatprep.mubr.bf16.mxu0 %v240_v26  ;;  %3651 = vmatpush3.bf16.msra.mxu0 %v4058_v42 }
  0xc9   : > { %3652 = vmatprep.subr.bf16.mxu0 %v4060_v44 }
  0xcc   : > { %3653 = vmatpush3.bf16.msra.mxu0 %v4060_v44 }
  0xcd   : > { %3654 = vmatprep.subr.bf16.mxu0 %v4062_v46 }
  0xcf   : > { %3599 = vmatmul.mubr.bf16.gmra.mxu0 %v242_v28 }
  0xd0   : > { %3602 = vmatprep.mubr.bf16.mxu0 %v244_v30  ;;  %3655 = vmatpush3.bf16.msra.mxu0 %v4062_v46 }
  0xd1   : > { %3656 = vmatprep.subr.bf16.mxu0 %v4064_v48 }
  0xd4   : > { %3657 = vmatpush3.bf16.msra.mxu0 %v4064_v48 }
  0xd5   : > { %3658 = vmatprep.subr.bf16.mxu0 %v4065_v50 }
  0xd7   : > { %3603 = vmatmul.mubr.bf16.gmra.mxu0 %v246_v32 }
  0xd8   : > { %3606 = vmatprep.mubr.bf16.mxu0 %v4048_v34  ;;  %3659 = vmatpush3.bf16.msra.mxu0 %v4065_v50 }
  0xd9   : > { %3660 = vmatprep.subr.bf16.mxu0 %v4067_v51 }
  0xdc   : > { %3661 = vmatpush3.bf16.msra.mxu0 %v4067_v51 }
  0xdf   : > { %3607 = vmatmul.mubr.bf16.gmra.mxu0 %v4050_v35 }
 0x157   : > { %v3520_v53 = vpop.f32.mrf.mxu0 }
 0x158   : > { %v3556_v54 = vpop.f32.mrf.mxu1 }
 0x159   : > { %v427_v55 = vpop.f32.mrf.mxu0  ;;  %v603_v20 = vadd.f32 %v3556_v54, %v3520_v53 }
 0x15a   : > { %v594_v56 = vpop.f32.mrf.mxu1 }
 0x15b   : > { %v3521_v57 = vpop.f32.mrf.mxu0  ;;  %v595_v22 = vadd.f32 %v594_v56, %v427_v55 }
 0x15c   : > { %v3557_v58 = vpop.f32.mrf.mxu1 }
 0x15d   : > { %v430_v59 = vpop.f32.mrf.mxu0  ;;  %v606_v27 = vadd.f32 %v3557_v58, %v3521_v57 }
 0x15e   : > { %v597_v61 = vpop.f32.mrf.mxu1 }
 0x15f   : > { %v3524_v60 = vpop.f32.mrf.mxu0  ;;  %v598_v31 = vadd.f32 %v597_v61, %v430_v59 }
 0x160   : > { %v3560_v0 = vpop.f32.mrf.mxu1 }
 0x161   : > { %v443_v62 = vpop.f32.mrf.mxu0  ;;  %v619_v38 = vadd.f32 %v3560_v0, %v3524_v60 }
 0x162   : > { %v610_v3 = vpop.f32.mrf.mxu1 }
 0x163   : > { %v3525_v63 = vpop.f32.mrf.mxu0  ;;  %v611_v41 = vadd.f32 %v610_v3, %v443_v62 }
 0x164   : > { %v3561_v6 = vpop.f32.mrf.mxu1 }
 0x165   : > { %v446_v1 = vpop.f32.mrf.mxu0  ;;  %v622_v45 = vadd.f32 %v3561_v6, %v3525_v63 }
 0x166   : > { %v613_v9 = vpop.f32.mrf.mxu1 }
 0x167   : > { %v3528_v2 = vpop.f32.mrf.mxu0  ;;  %v614_v48 = vadd.f32 %v613_v9, %v446_v1 }
 0x168   : > { %v3564_v12 = vpop.f32.mrf.mxu1 }
 0x169   : > { %v459_v4 = vpop.f32.mrf.mxu0  ;;  %v635_v54 = vadd.f32 %v3564_v12, %v3528_v2 }
 0x16a   : > { %v626_v15 = vpop.f32.mrf.mxu1 }
 0x16b   : > { %v4736_v5 = vpop.f32.mrf.mxu0  ;;  %v627_v59 = vadd.f32 %v626_v15, %v459_v4 }
 0x16c   : > { %v3565_v18 = vpop.f32.mrf.mxu1 }
 0x16d   : > { %v4738_v7 = vpop.f32.mrf.mxu0  ;;  %v638_v0 = vadd.f32 %v3565_v18, %v4736_v5 }
 0x16e   : > { %v629_v25 = vpop.f32.mrf.mxu1 }
 0x16f   : > { %v4740_v8 = vpop.f32.mrf.mxu0  ;;  %v630_v9 = vadd.f32 %v629_v25, %v4738_v7 }
 0x170   : > { %v3568_v33 = vpop.f32.mrf.mxu1 }
 0x171   : > { %v4742_v10 = vpop.f32.mrf.mxu0 }
 0x172   : > { %v642_v42 = vpop.f32.mrf.mxu1 }
 0x173   : > { %v4744_v11 = vpop.f32.mrf.mxu0 }
 0x174   : > { %v3569_v50 = vpop.f32.mrf.mxu1 }
 0x175   : > { %v4746_v13 = vpop.f32.mrf.mxu0 }
 0x176   : > { %v645_v62 = vpop.f32.mrf.mxu1 }
 0x177   : > { %v4748_v14 = vpop.f32.mrf.mxu0 }
 0x178   : > { %v3572_v15 = vpop.f32.mrf.mxu1 }
 0x179   : > { %v4750_v16 = vpop.f32.mrf.mxu0 }
 0x17b   : > { %v4752_v17 = vpop.f32.mrf.mxu0 }
 0x17d   : > { %v4754_v19 = vpop.f32.mrf.mxu0 }
 0x17f   : > { %v3592_v21 = vpop.f32.mrf.mxu0 }
 0x180   : > { %v859_v23 = vadd.f32 %v3592_v21, %v603_v20 }
 0x181   : > { %v778_v26 = vpop.f32.mrf.mxu0 }
 0x182   : > { %v857_v28 = vadd.f32 %v778_v26, %v595_v22  ;;  %v886_v29 = vadd.f32 %v4756_v24, %v859_v23  ;;  %v651_v23 = vadd.f32 %v3568_v33, %v4740_v8  ;;  %v4068_v8 = vld [vmem:[#allocation4 + $0x170] sm:$0xff]  }
 0x183   : > { %v3593_v30 = vpop.f32.mrf.mxu0 }
 0x184   : > { %v860_v32 = vadd.f32 %v3593_v30, %v606_v27  ;;  %v884_v34 = vadd.f32 %v4756_v24, %v857_v28  ;;  %4131 = vtanh.f32 %v886_v29  ;;  %v643_v28 = vadd.f32 %v642_v42, %v4742_v10 }
 0x185   : > { %v781_v35 = vpop.f32.mrf.mxu0 }
 0x186   : > { %v887_v36 = vadd.f32 %v4756_v24, %v860_v32  ;;  %v858_v37 = vadd.f32 %v781_v35, %v598_v31  ;;  %v658_v31 = vpop.f32.mrf.mxu1 }
 0x187   : > { %v3596_v39 = vpop.f32.mrf.mxu0 }
 0x188   : > { %4133 = vtanh.f32 %v887_v36  ;;  %v885_v40 = vadd.f32 %v4756_v24, %v858_v37  ;;  %v863_v43 = vadd.f32 %v3596_v39, %v619_v38 }
 0x189   : > { %4135 = vtanh.f32 %v884_v34  ;;  %v794_v44 = vpop.f32.mrf.mxu0  ;;  %v654_v34 = vadd.f32 %v3569_v50, %v4744_v11 }
 0x18a   : > { %4137 = vtanh.f32 %v885_v40  ;;  %v861_v46 = vadd.f32 %v794_v44, %v611_v41  ;;  %v890_v51 = vadd.f32 %v4756_v24, %v863_v43  ;;  %v646_v40 = vadd.f32 %v645_v62, %v4746_v13  ;;  %v3573_v44 = vpop.f32.mrf.mxu1 }
 0x18b   : > { %v3597_v47 = vpop.f32.mrf.mxu0  ;;  %v667_v13 = vadd.f32 %v3572_v15, %v4748_v14 }
 0x18c   : > { %v864_v49 = vadd.f32 %v3597_v47, %v622_v45  ;;  %v888_v57 = vadd.f32 %v4756_v24, %v861_v46 }
 0x18d   : > { %v797_v53 = vpop.f32.mrf.mxu0 }
 0x18e   : > { %v891_v55 = vadd.f32 %v4756_v24, %v864_v49  ;;  %v862_v56 = vadd.f32 %v797_v53, %v614_v48  ;;  %v4069_v48 = vld [vmem:[#allocation4 + $0x168] sm:$0xff]  }
 0x18f   : > { %v3600_v58 = vpop.f32.mrf.mxu0 }
 0x190   : > { %4139 = vtanh.f32 %v891_v55  ;;  %v889_v60 = vadd.f32 %v4756_v24, %v862_v56  ;;  %v867_v61 = vadd.f32 %v3600_v58, %v635_v54  ;;  %v659_v55 = vadd.f32 %v658_v31, %v4750_v16 }
 0x191   : > { %4141 = vtanh.f32 %v890_v51  ;;  %v810_v63 = vpop.f32.mrf.mxu0  ;;  %v4132_v6 = vpop.eup %4131 }
 0x192   : > { %4143 = vtanh.f32 %v889_v60  ;;  %v865_v1 = vadd.f32 %v810_v63, %v627_v59  ;;  %v894_v2 = vadd.f32 %v4756_v24, %v867_v61  ;;  %v661_v61 = vpop.f32.mrf.mxu1 }
 0x193   : > { %4145 = vtanh.f32 %v888_v57  ;;  %v3601_v3 = vpop.f32.mrf.mxu0 }
 0x194   : > { %v868_v12 = vadd.f32 %v3601_v3, %v638_v0  ;;  %v892_v20 = vadd.f32 %v4756_v24, %v865_v1  ;;  %4147 = vtanh.f32 %v894_v2  ;;  %v670_v1 = vadd.f32 %v3573_v44, %v4752_v17  ;;  %v4070_v3 = vld [vmem:[#allocation4 + $0x160] sm:$0xff]  }
 0x195   : > { %v4134_v4 = vpop.eup %4133  ;;  %v813_v21 = vpop.f32.mrf.mxu0 }
 0x196   : > { %v4136_v22 = vpop.eup %4135  ;;  %v895_v5 = vadd.f32 %v4756_v24, %v868_v12  ;;  %v866_v18 = vadd.f32 %v813_v21, %v630_v9  ;;  %v4772_v26 = vpack.c.bf16 %v4134_v4, %v4132_v6 }
 0x197   : > { %v4138_v27 = vpop.eup %4137  ;;  %v3604_v29 = vpop.f32.mrf.mxu0 }
 0x198   : > { %4149 = vtanh.f32 %v895_v5  ;;  %v893_v7 = vadd.f32 %v4756_v24, %v866_v18  ;;  %v871_v25 = vadd.f32 %v3604_v29, %v651_v23  ;;  %v4776_v30 = vpack.c.bf16 %v4138_v27, %v4136_v22 }
 0x199   : > { %4151 = vtanh.f32 %v892_v20  ;;  %v826_v32 = vpop.f32.mrf.mxu0  ;;  %v942_v33 = vshrl.u32 %v4772_v26, 16  ;;  %v945_v39 = vshll.u32 %v4772_v26, 16  ;;  %v662_v20 = vadd.f32 %v661_v61, %v4754_v19 }
 0x19a   : > { %4153 = vtanh.f32 %v893_v7  ;;  %v869_v35 = vadd.f32 %v826_v32, %v643_v28  ;;  %3626 = vmatprep.mubr.bf16.mxu1 %v4776_v30  ;;  %v935_v10 = vshrl.u32 %v4776_v30, 16  ;;  %v898_v36 = vadd.f32 %v4756_v24, %v871_v25 }
 0x19b   : > { %v3605_v37 = vpop.f32.mrf.mxu0  ;;  %3627 = vmatmul.mubr.bf16.vlgmr.msra.gmra.mxu1 %v4772_v26  ;;  %v944_v38 = vrot.slane %v942_v33, 7  ;;  %v938_v42 = vshll.u32 %v4776_v30, 16 }
 0x19c   : > { %v872_v11 = vadd.f32 %v3605_v37, %v654_v34  ;;  %3683 = vmatpush3.bf16.msra.mxu1 %v4733_v52  ;;  %v937_v41 = vrot.slane %v935_v10, 7  ;;  %v896_v45 = vadd.f32 %v4756_v24, %v869_v35  ;;  %4155 = vtanh.f32 %v898_v36 }
 0x19d   : > { %v4140_v43 = vpop.eup %4139  ;;  %v829_v46 = vpop.f32.mrf.mxu0  ;;  %3684 = vmatprep.subr.bf16.mxu1 %v4068_v8  ;;  %v947_v47 = vor.u32 %v945_v39, %v944_v38 }
 0x19e   : > { %v4142_v49 = vpop.eup %4141  ;;  %v899_v52 = vadd.f32 %v4756_v24, %v872_v11  ;;  %v870_v50 = vadd.f32 %v829_v46, %v646_v40  ;;  %v940_v51 = vor.u32 %v938_v42, %v937_v41  ;;  %v4072_v11 = vld [vmem:[#allocation4 + $0x150] sm:$0xff]  }
 0x19f   : > { %v4144_v54 = vpop.eup %4143  ;;  %v3608_v56 = vpop.f32.mrf.mxu0  ;;  %v4806_v57 = vpack.c.bf16 %v4140_v43, %v4142_v49  ;;  %v1018_v16 = vsel %vm4801_vm2, 0, %v947_v47 }
 0x1a0   : > { %v4146_v14 = vpop.eup %4145  ;;  %4157 = vtanh.f32 %v899_v52  ;;  %v897_v58 = vadd.f32 %v4756_v24, %v870_v50  ;;  %v875_v59 = vadd.f32 %v3608_v56, %v667_v13  ;;  %v1017_v60 = vsel %vm4801_vm2, 0, %v940_v51  ;;  %3685 = vmatpush3.bf16.msra.mxu1 %v4068_v8  ;;  %v4071_v8 = vld [vmem:[#allocation4 + $0x158] sm:$0xff]   ;;  %v4073_v52 = vld [vmem:[#allocation4 + $0x148] sm:$0xff]  }
 0x1a1   : > { %4159 = vtanh.f32 %v896_v45  ;;  %v842_v62 = vpop.f32.mrf.mxu0  ;;  %3662 = vmatprep.mubr.bf16.mxu0 %v1017_v60  ;;  %v4811_v63 = vpack.c.bf16 %v4144_v54, %v4146_v14  ;;  %3686 = vmatprep.subr.bf16.mxu1 %v4069_v48  ;;  %v956_v0 = vshrl.u32 %v4806_v57, 16  ;;  %v4148_v15 = vpop.eup %4147  ;;  %v959_v17 = vshll.u32 %v4806_v57, 16 }
 0x1a2   : > { %4161 = vtanh.f32 %v897_v58  ;;  %v873_v2 = vadd.f32 %v842_v62, %v659_v55  ;;  %3663 = vmatmul.mubr.bf16.vlgmr.msra.gmra.mxu0 %v1018_v16  ;;  %v902_v6 = vadd.f32 %v4756_v24, %v875_v59  ;;  %v4074_v59 = vld [vmem:[#allocation4 + $0x140] sm:$0xff]   ;;  %v1027_v60 = vrot.slane %v938_v42, 1 }
 0x1a3   : > { %3630 = vmatprep.mubr.bf16.mxu1 %v4811_v63  ;;  %v3609_v9 = vpop.f32.mrf.mxu0  ;;  %v949_v12 = vshrl.u32 %v4811_v63, 16  ;;  %v958_v4 = vrot.slane %v956_v0, 7  ;;  %v952_v27 = vshll.u32 %v4811_v63, 16 }
 0x1a4   : > { %v876_v21 = vadd.f32 %v3609_v9, %v670_v1  ;;  %3631 = vmatmul.mubr.bf16.gmra.mxu1 %v4806_v57  ;;  %v900_v23 = vadd.f32 %v4756_v24, %v873_v2  ;;  %4163 = vtanh.f32 %v902_v6  ;;  %v1028_v42 = vor.u32 %v1027_v60, %v935_v10  ;;  %v4085_v60 = vld [vmem:[#allocation4 + $0x190] sm:$0xff]  }
 0x1a5   : > { %v4150_v22 = vpop.eup %4149  ;;  %v845_v5 = vpop.f32.mrf.mxu0  ;;  %3687 = vmatpush3.bf16.msra.mxu1 %v4069_v48  ;;  %v951_v18 = vrot.slane %v949_v12, 7  ;;  %v961_v19 = vor.u32 %v959_v17, %v958_v4 }
 0x1a6   : > { %v4152_v28 = vpop.eup %4151  ;;  %v903_v29 = vadd.f32 %v4756_v24, %v876_v21  ;;  %v874_v7 = vadd.f32 %v845_v5, %v662_v20  ;;  %3688 = vmatprep.subr.bf16.mxu1 %v4070_v3  ;;  %v4832_v25 = vpack.c.bf16 %v4150_v22, %v4148_v15 }
 0x1a7   : > { %v4154_v31 = vpop.eup %4153  ;;  %v954_v32 = vor.u32 %v952_v27, %v951_v18  ;;  %v1020_v38 = vsel %vm4801_vm2, 0, %v961_v19  ;;  %v1060_v18 = vsel %vm4886_vm5, %v1028_v42, 0 }
 0x1a8   : > { %4165 = vtanh.f32 %v903_v29  ;;  %v901_v34 = vadd.f32 %v4756_v24, %v874_v7  ;;  %v4837_v35 = vpack.c.bf16 %v4154_v31, %v4152_v28  ;;  %v970_v36 = vshrl.u32 %v4832_v25, 16 }
 0x1a9   : > { %4167 = vtanh.f32 %v900_v23  ;;  %v1019_v37 = vsel %vm4801_vm2, 0, %v954_v32  ;;  %3689 = vmatpush3.bf16.msra.mxu1 %v4070_v3  ;;  %v4156_v41 = vpop.eup %4155  ;;  %v973_v45 = vshll.u32 %v4832_v25, 16  ;;  %v1029_v28 = vrot.slane %v945_v39, 1 }
 0x1aa   : > { %4169 = vtanh.f32 %v901_v34  ;;  %3666 = vmatprep.mubr.bf16.mxu0 %v1019_v37  ;;  %3634 = vmatprep.mubr.bf16.mxu1 %v4837_v35  ;;  %v963_v40 = vshrl.u32 %v4837_v35, 16  ;;  %v972_v24 = vrot.slane %v970_v36, 7  ;;  %v966_v44 = vshll.u32 %v4837_v35, 16 }
 0x1ab   : > { %3667 = vmatmul.mubr.bf16.gmra.mxu0 %v1020_v38  ;;  %3690 = vmatprep.subr.bf16.mxu1 %v4071_v8  ;;  %v1031_v31 = vrot.slane %v952_v27, 1  ;;  %v1030_v34 = vor.u32 %v1029_v28, %v942_v33 }
 0x1ac   : > { %3635 = vmatmul.mubr.bf16.gmra.mxu1 %v4832_v25  ;;  %v965_v43 = vrot.slane %v963_v40, 7  ;;  %v975_v49 = vor.u32 %v973_v45, %v972_v24  ;;  %v1033_v24 = vrot.slane %v959_v17, 1  ;;  %v1035_v33 = vrot.slane %v966_v44, 1 }
 0x1ad   : > { %v4158_v46 = vpop.eup %4157  ;;  %3691 = vmatpush3.bf16.msra.mxu1 %v4071_v8  ;;  %v1032_v39 = vor.u32 %v1031_v31, %v949_v12  ;;  %v1061_v27 = vsel %vm4886_vm5, %v1030_v34, 0  ;;  %v1037_v17 = vrot.slane %v973_v45, 1 }
 0x1ae   : > { %v4160_v47 = vpop.eup %4159  ;;  %v968_v48 = vor.u32 %v966_v44, %v965_v43  ;;  %v4857_v13 = vpack.c.bf16 %v4158_v46, %v4156_v41  ;;  %3692 = vmatprep.subr.bf16.mxu1 %v4072_v11  ;;  %v1022_v56 = vsel %vm4801_vm2, 0, %v975_v49  ;;  %v1034_v63 = vor.u32 %v1033_v24, %v956_v0 }
 0x1af   : > { %v4162_v50 = vpop.eup %4161  ;;  %v1062_v26 = vsel %vm4886_vm5, %v1032_v39, 0  ;;  %v1036_v12 = vor.u32 %v1035_v33, %v963_v40  ;;  %v1038_v44 = vor.u32 %v1037_v17, %v970_v36 }
 0x1b0   : > { %v1021_v51 = vsel %vm4801_vm2, 0, %v968_v48  ;;  %v4861_v54 = vpack.c.bf16 %v4162_v50, %v4160_v47  ;;  %v984_v55 = vshrl.u32 %v4857_v13, 16  ;;  %v987_v1 = vshll.u32 %v4857_v13, 16  ;;  %v4076_v50 = vld [vmem:[#allocation4 + $0x1b8] sm:$0xff]  }
 0x1b1   : > { %3670 = vmatprep.mubr.bf16.mxu0 %v1021_v51  ;;  %3693 = vmatpush3.bf16.msra.mxu1 %v4072_v11  ;;  %v4164_v61 = vpop.eup %4163  ;;  %v1063_v11 = vsel %vm4886_vm5, %v1034_v63, 0  ;;  %v1064_v41 = vsel %vm4886_vm5, %v1036_v12, 0  ;;  %v1065_v0 = vsel %vm4886_vm5, %v1038_v44, 0  ;;  %v4075_v51 = vld [vmem:[#allocation4 + $0x1f8] sm:$0xff]  }
 0x1b2   : > { %3638 = vmatprep.mubr.bf16.mxu1 %v4861_v54  ;;  %v977_v14 = vshrl.u32 %v4861_v54, 16  ;;  %3694 = vmatprep.subr.bf16.mxu1 %v4073_v52  ;;  %v986_v58 = vrot.slane %v984_v55, 7  ;;  %v980_v16 = vshll.u32 %v4861_v54, 16  ;;  %v1041_v35 = vrot.slane %v987_v1, 1  ;;  %v4079_v54 = vld [vmem:[#allocation4 + $0x1a8] sm:$0xff]  }
 0x1b3   : > { %3671 = vmatmul.mubr.bf16.gmra.mxu0 %v1022_v56  ;;  %3718 = vmatprep.subr.bf16.mxu0 %v4075_v51  ;;  %v4081_v56 = vld [vmem:[#allocation4 + $0x1a0] sm:$0xff]  }
 0x1b4   : > { %3639 = vmatmul.mubr.bf16.gmra.mxu1 %v4857_v13  ;;  %v979_v62 = vrot.slane %v977_v14, 7  ;;  %v989_v9 = vor.u32 %v987_v1, %v986_v58  ;;  %v1039_v43 = vrot.slane %v980_v16, 1  ;;  %v1042_v46 = vor.u32 %v1041_v35, %v984_v55  ;;  %v4078_v13 = vld [vmem:[#allocation4 + $0x1b0] sm:$0xff]   ;;  %3719 = vmatpush3.bf16.msra.mxu0 %v4075_v51  ;;  %v4083_v58 = vld [vmem:[#allocation4 + $0x198] sm:$0xff]   ;;  %v4088_v1 = vld [vmem:[#allocation4 + $0x180] sm:$0xff]  }
 0x1b5   : > { %v4166_v2 = vpop.eup %4165  ;;  %3695 = vmatpush3.bf16.msra.mxu1 %v4073_v52  ;;  %v4077_v55 = vld [vmem:[#allocation4 + $0x1f0] sm:$0xff]   ;;  %v4965_v35 = vld [vmem:[#allocation7 + $0x1] ss:$0 sm:$0xff] }
 0x1b6   : > { %v4168_v3 = vpop.eup %4167  ;;  %v982_v6 = vor.u32 %v980_v16, %v979_v62  ;;  %v4877_v4 = vpack.c.bf16 %v4166_v2, %v4164_v61  ;;  %3696 = vmatprep.subr.bf16.mxu1 %v4074_v59  ;;  %v1024_v23 = vsel %vm4801_vm2, 0, %v989_v9  ;;  %v1040_v57 = vor.u32 %v1039_v43, %v977_v14  ;;  %3720 = vmatprep.subr.bf16.mxu0 %v4077_v55  ;;  %v4080_v14 = vld [vmem:[#allocation4 + $0x1e8] sm:$0xff]   ;;  %v4084_v61 = vld [vmem:[#allocation4 + $0x1d8] sm:$0xff]   ;;  %v4086_v16 = vld [vmem:[#allocation4 + $0x1d0] sm:$0xff]  }
 0x1b7   : > { %v4170_v15 = vpop.eup %4169  ;;  %v1067_v25 = vsel %vm4886_vm5, %v1042_v46, 0  ;;  %v4087_v62 = vld [vmem:[#allocation4 + $0x188] sm:$0xff]  }
 0x1b8   : > { %v1023_v20 = vsel %vm4801_vm2, 0, %v982_v6  ;;  %v932_v21 = vpack.c.bf16 %v4170_v15, %v4168_v3  ;;  %v998_v22 = vshrl.u32 %v4877_v4, 16  ;;  %v1001_v19 = vshll.u32 %v4877_v4, 16  ;;  %3721 = vmatpush3.bf16.msra.mxu0 %v4077_v55  ;;  %v4089_v2 = vld [vmem:[#allocation4 + $0x1c8] sm:$0xff]   ;;  %v4090_v3 = vld [vmem:[#allocation4 + $0x1c0] sm:$0xff]   ;;  %v4940_v6 = vld [vmem:[#allocation4 + $0x238] sm:$0xff]  }
 0x1b9   : > { %3674 = vmatprep.mubr.bf16.mxu0 %v1023_v20  ;;  %3697 = vmatpush3.bf16.msra.mxu1 %v4074_v59  ;;  %v1066_v40 = vsel %vm4886_vm5, %v1040_v57, 0  ;;  %v4082_v59 = vld [vmem:[#allocation4 + $0x1e0] sm:$0xff]  }
 0x1ba   : > { %3642 = vmatprep.mubr.bf16.mxu1 %v932_v21  ;;  %v991_v30 = vshrl.u32 %v932_v21, 16  ;;  %v1000_v10 = vrot.slane %v998_v22, 7  ;;  %v994_v7 = vshll.u32 %v932_v21, 16  ;;  %v1045_v36 = vrot.slane %v1001_v19, 1  ;;  %3750 = vmatprep.subr.bf16.mxu1 %v4076_v50 }
 0x1bb   : > { %3675 = vmatmul.mubr.bf16.gmra.mxu0 %v1024_v23  ;;  %3722 = vmatprep.subr.bf16.mxu0 %v4080_v14 }
 0x1bc   : > { %3643 = vmatmul.mubr.bf16.gmra.mxu1 %v4877_v4  ;;  %v993_v29 = vrot.slane %v991_v30, 7  ;;  %v1003_v8 = vor.u32 %v1001_v19, %v1000_v10  ;;  %v1043_v45 = vrot.slane %v994_v7, 1  ;;  %v1046_v49 = vor.u32 %v1045_v36, %v998_v22  ;;  %3723 = vmatpush3.bf16.msra.mxu0 %v4080_v14 }
 0x1bd   : > { %3698 = vmatprep.mubr.bf16.mxu1 %v1060_v18  ;;  %3724 = vmatprep.subr.bf16.mxu0 %v4082_v59 }
 0x1be   : > { %v996_v32 = vor.u32 %v994_v7, %v993_v29  ;;  %v1026_v38 = vsel %vm4801_vm2, 0, %v1003_v8  ;;  %v1044_v47 = vor.u32 %v1043_v45, %v991_v30  ;;  %v1069_v52 = vsel %vm4886_vm5, %v1046_v49, 0 }
 0x1c0   : > { %v1025_v37 = vsel %vm4801_vm2, 0, %v996_v32  ;;  %v1068_v48 = vsel %vm4886_vm5, %v1044_v47, 0  ;;  %3725 = vmatpush3.bf16.msra.mxu0 %v4082_v59 }
 0x1c1   : > { %3678 = vmatprep.mubr.bf16.mxu0 %v1025_v37  ;;  %3726 = vmatprep.subr.bf16.mxu0 %v4084_v61 }
 0x1c3   : > { %3679 = vmatmul.mubr.bf16.gmra.mxu0 %v1026_v38 }
 0x1c4   : > { %3699 = vmatmul.mubr.bf16.vlgmr.msra.gmra.mxu1 %v1061_v27  ;;  %3727 = vmatpush3.bf16.msra.mxu0 %v4084_v61 }
 0x1c5   : > { %3702 = vmatprep.mubr.bf16.mxu1 %v1062_v26  ;;  %3751 = vmatpush3.bf16.msra.mxu1 %v4076_v50 }
 0x1c6   : > { %3752 = vmatprep.subr.bf16.mxu1 %v4078_v13  ;;  %3728 = vmatprep.subr.bf16.mxu0 %v4086_v16 }
 0x1c8   : > { %3729 = vmatpush3.bf16.msra.mxu0 %v4086_v16  ;;  %v4975_v16 = vstv %s1682_s22 }
 0x1c9   : > { %3753 = vmatpush3.bf16.msra.mxu1 %v4078_v13  ;;  %3730 = vmatprep.subr.bf16.mxu0 %v4089_v2  ;;  %vm1693_vm8 = vcmp.ge.s32.totalorder %v4975_v16, 2  ;;  %vm1703_vm9 = vcmp.lt.s32.totalorder %v4975_v16, 18 }
 0x1ca   : > { %3754 = vmatprep.subr.bf16.mxu1 %v4079_v54  ;;  %vm1713_vm11 = vmand %vm1693_vm8, %vm1703_vm9 }
 0x1cc   : > { %3703 = vmatmul.mubr.bf16.gmra.mxu1 %v1063_v11  ;;  %3731 = vmatpush3.bf16.msra.mxu0 %v4089_v2 }
 0x1cd   : > { %3706 = vmatprep.mubr.bf16.mxu1 %v1064_v41  ;;  %3755 = vmatpush3.bf16.msra.mxu1 %v4079_v54 }
 0x1ce   : > { %3756 = vmatprep.subr.bf16.mxu1 %v4081_v56  ;;  %3732 = vmatprep.subr.bf16.mxu0 %v4090_v3 }
 0x1d0   : > { %3733 = vmatpush3.bf16.msra.mxu0 %v4090_v3 }
 0x1d1   : > { %3757 = vmatpush3.bf16.msra.mxu1 %v4081_v56  ;;  %3782 = vmatprep.subr.bf16.mxu0 %v4940_v6 }
 0x1d2   : > { %3758 = vmatprep.subr.bf16.mxu1 %v4083_v58 }
 0x1d4   : > { %3707 = vmatmul.mubr.bf16.gmra.mxu1 %v1065_v0 }
 0x1d5   : > { %3710 = vmatprep.mubr.bf16.mxu1 %v1066_v40  ;;  %3759 = vmatpush3.bf16.msra.mxu1 %v4083_v58 }
 0x1d6   : > { %3760 = vmatprep.subr.bf16.mxu1 %v4085_v60 }
 0x1d9   : > { %3761 = vmatpush3.bf16.msra.mxu1 %v4085_v60 }
 0x1da   : > { %3762 = vmatprep.subr.bf16.mxu1 %v4087_v62 }
 0x1dc   : > { %3711 = vmatmul.mubr.bf16.gmra.mxu1 %v1067_v25 }
 0x1dd   : > { %3714 = vmatprep.mubr.bf16.mxu1 %v1068_v48  ;;  %3763 = vmatpush3.bf16.msra.mxu1 %v4087_v62 }
 0x1de   : > { %3764 = vmatprep.subr.bf16.mxu1 %v4088_v1 }
 0x1e1   : > { %3765 = vmatpush3.bf16.msra.mxu1 %v4088_v1 }
 0x1e4   : > { %3715 = vmatmul.mubr.bf16.gmra.mxu1 %v1069_v52 }
 0x25b   : > { %v3628_v9 = vpop.f32.mrf.mxu1 }
 0x25d   : > { %v1186_v4 = vpop.f32.mrf.mxu1 }
 0x25f   : > { %v3629_v15 = vpop.f32.mrf.mxu1 }
 0x261   : > { %v1189_v42 = vpop.f32.mrf.mxu1 }
 0x262   : > { %v3664_v20 = vpop.f32.mrf.mxu0 }
 0x263   : > { %v1356_v43 = vadd.f32 %v3664_v20, %v3628_v9  ;;  %v1684_v20 = vadd.s32 1, %v4975_v16 }
 0x264   : > { %v3632_v21 = vpop.f32.mrf.mxu1  ;;  %v1347_v22 = vpop.f32.mrf.mxu0 }
 0x265   : > { %v1348_v57 = vadd.f32 %v1347_v22, %v1186_v4  ;;  %vm1694_vm6 = vcmp.ge.s32.totalorder %v1684_v20, 2  ;;  %vm1704_vm7 = vcmp.lt.s32.totalorder %v1684_v20, 18  ;;  %v4105_v20 = vld [vmem:[#allocation4 + $0x268] sm:$0xff]  }
 0x266   : > { %v1202_v23 = vpop.f32.mrf.mxu1  ;;  %v3665_v30 = vpop.f32.mrf.mxu0  ;;  %vm4989_vm10 = vmand %vm1694_vm6, %vm1704_vm7 }
 0x267   : > { %v1359_v46 = vadd.f32 %v3665_v30, %v3629_v15 }
 0x268   : > { %v3633_v10 = vpop.f32.mrf.mxu1  ;;  %v1350_v18 = vpop.f32.mrf.mxu0 }
 0x269   : > { %v1351_v48 = vadd.f32 %v1350_v18, %v1189_v42 }
 0x26a   : > { %v1205_v28 = vpop.f32.mrf.mxu1 }
 0x26b   : > { %v3668_v29 = vpop.f32.mrf.mxu0 }
 0x26c   : > { %v4943_v7 = vpop.f32.mrf.mxu1  ;;  %v1372_v58 = vadd.f32 %v3668_v29, %v3632_v21 }
 0x26d   : > { %v1363_v19 = vpop.f32.mrf.mxu0 }
 0x26e   : > { %v1218_v31 = vpop.f32.mrf.mxu1  ;;  %v1364_v56 = vadd.f32 %v1363_v19, %v1202_v23 }
 0x26f   : > { %v3669_v8 = vpop.f32.mrf.mxu0 }
 0x270   : > { %v4945_v32 = vpop.f32.mrf.mxu1  ;;  %v1375_v61 = vadd.f32 %v3669_v8, %v3633_v10 }
 0x271   : > { %v1366_v39 = vpop.f32.mrf.mxu0 }
 0x272   : > { %v4947_v34 = vpop.f32.mrf.mxu1  ;;  %v1367_v3 = vadd.f32 %v1366_v39, %v1205_v28 }
 0x273   : > { %v3672_v24 = vpop.f32.mrf.mxu0 }
 0x274   : > { %v4949_v37 = vpop.f32.mrf.mxu1  ;;  %v1388_v29 = vadd.f32 %v3672_v24, %v4943_v7 }
 0x275   : > { %v1379_v63 = vpop.f32.mrf.mxu0 }
 0x276   : > { %v4951_v38 = vpop.f32.mrf.mxu1  ;;  %v1380_v10 = vadd.f32 %v1379_v63, %v1218_v31 }
 0x277   : > { %v3673_v17 = vpop.f32.mrf.mxu0 }
 0x278   : > { %v4953_v27 = vpop.f32.mrf.mxu1  ;;  %v1391_v8 = vadd.f32 %v3673_v17, %v4945_v32 }
 0x279   : > { %v1382_v40 = vpop.f32.mrf.mxu0 }
 0x27a   : > { %v4955_v26 = vpop.f32.mrf.mxu1  ;;  %v1383_v63 = vadd.f32 %v1382_v40, %v4947_v34 }
 0x27b   : > { %v4968_v52 = vpop.f32.mrf.mxu0 }
 0x27c   : > { %v4957_v33 = vpop.f32.mrf.mxu1 }
 0x27d   : > { %v1395_v59 = vpop.f32.mrf.mxu0 }
 0x27e   : > { %v4959_v12 = vpop.f32.mrf.mxu1 }
 0x27f   : > { %v3677_v15 = vpop.f32.mrf.mxu0 }
 0x280   : > { %v4961_v11 = vpop.f32.mrf.mxu1 }
 0x281   : > { %v1398_v28 = vpop.f32.mrf.mxu0 }
 0x282   : > { %v4963_v41 = vpop.f32.mrf.mxu1 }
 0x284   : > { %v3700_v44 = vpop.f32.mrf.mxu1 }
 0x285   : > { %v1606_v0 = vadd.f32 %v3700_v44, %v1356_v43 }
 0x286   : > { %v1525_v45 = vpop.f32.mrf.mxu1 }
 0x287   : > { %v1604_v47 = vadd.f32 %v1525_v45, %v1348_v57  ;;  %v1634_v25 = vadd.f32 %v4965_v35, %v1606_v0  ;;  %v3680_v0 = vpop.f32.mrf.mxu0 }
 0x288   : > { %v3701_v36 = vpop.f32.mrf.mxu1 }
 0x289   : > { %v1607_v49 = vadd.f32 %v3701_v36, %v1359_v46  ;;  %v1632_v50 = vadd.f32 %v4965_v35, %v1604_v47  ;;  %4171 = vtanh.f32 %v1634_v25 }
 0x28a   : > { %v1528_v51 = vpop.f32.mrf.mxu1 }
 0x28b   : > { %v1635_v13 = vadd.f32 %v4965_v35, %v1607_v49  ;;  %v1605_v54 = vadd.f32 %v1528_v51, %v1351_v48  ;;  %v1685_v48 = vadd.s32 2, %v4975_v16  ;;  %v1396_v49 = vadd.f32 %v1395_v59, %v4951_v38 }
 0x28c   : > { %v3704_v55 = vpop.f32.mrf.mxu1 }
 0x28d   : > { %4173 = vtanh.f32 %v1635_v13  ;;  %v1633_v14 = vadd.f32 %v4965_v35, %v1605_v54  ;;  %v1610_v1 = vadd.f32 %v3704_v55, %v1372_v58  ;;  %v1404_v13 = vadd.f32 %v4968_v52, %v4949_v37  ;;  %v1411_v54 = vpop.f32.mrf.mxu0 }
 0x28e   : > { %4175 = vtanh.f32 %v1632_v50  ;;  %v1541_v60 = vpop.f32.mrf.mxu1  ;;  %vm1695_vm12 = vcmp.ge.s32.totalorder %v1685_v48, 2  ;;  %vm1705_vm13 = vcmp.lt.s32.totalorder %v1685_v48, 18  ;;  %v1690_v48 = vadd.s32 7, %v4975_v16 }
 0x28f   : > { %4177 = vtanh.f32 %v1633_v14  ;;  %v1608_v62 = vadd.f32 %v1541_v60, %v1364_v56  ;;  %v1638_v23 = vadd.f32 %v4965_v35, %v1610_v1  ;;  %v1686_v56 = vadd.s32 3, %v4975_v16  ;;  %vm5015_vm0 = vmand %vm1695_vm12, %vm1705_vm13 }
 0x290   : > { %v3705_v2 = vpop.f32.mrf.mxu1  ;;  %v1407_v14 = vadd.f32 %v3677_v15, %v4953_v27  ;;  %v1399_v60 = vadd.f32 %v1398_v28, %v4955_v26  ;;  %v1412_v15 = vadd.f32 %v1411_v54, %v4959_v12  ;;  %v4092_v28 = vld [vmem:[#allocation4 + $0x230] sm:$0xff]   ;;  %vm1700_vm12 = vcmp.ge.s32.totalorder %v1690_v48, 2 }
 0x291   : > { %v1636_v9 = vadd.f32 %v4965_v35, %v1608_v62  ;;  %v1611_v4 = vadd.f32 %v3705_v2, %v1375_v61  ;;  %v3681_v62 = vpop.f32.mrf.mxu0  ;;  %vm1696_vm14 = vcmp.ge.s32.totalorder %v1686_v56, 2  ;;  %vm1706_vm15 = vcmp.lt.s32.totalorder %v1686_v56, 18  ;;  %v4111_v12 = vld [vmem:[#allocation4 + $0x250] sm:$0xff]  }
 0x292   : > { %v1544_v42 = vpop.f32.mrf.mxu1  ;;  %v1420_v2 = vadd.f32 %v3680_v0, %v4957_v33  ;;  %vm5025_vm1 = vmand %vm1696_vm14, %vm1706_vm15  ;;  %vm1710_vm13 = vcmp.lt.s32.totalorder %v1690_v48, 18 }
 0x293   : > { %v1639_v21 = vadd.f32 %v4965_v35, %v1611_v4  ;;  %v1609_v22 = vadd.f32 %v1544_v42, %v1367_v3  ;;  %4179 = vtanh.f32 %v1636_v9  ;;  %vm5073_vm15 = vmand %vm1700_vm12, %vm1710_vm13 }
 0x294   : > { %v3708_v30 = vpop.f32.mrf.mxu1 }
 0x295   : > { %v1637_v18 = vadd.f32 %v4965_v35, %v1609_v22  ;;  %4181 = vtanh.f32 %v1639_v21  ;;  %v1614_v43 = vadd.f32 %v3708_v30, %v1388_v29  ;;  %v1687_v21 = vadd.s32 4, %v4975_v16 }
 0x296   : > { %v1557_v19 = vpop.f32.mrf.mxu1  ;;  %v4172_v31 = vpop.eup %4171 }
 0x297   : > { %4183 = vtanh.f32 %v1637_v18  ;;  %v1612_v39 = vadd.f32 %v1557_v19, %v1380_v10  ;;  %v1642_v34 = vadd.f32 %v4965_v35, %v1614_v43  ;;  %v1414_v10 = vpop.f32.mrf.mxu0  ;;  %v1688_v19 = vadd.s32 5, %v4975_v16 }
 0x298   : > { %4185 = vtanh.f32 %v1638_v23  ;;  %v3709_v44 = vpop.f32.mrf.mxu1  ;;  %vm1697_vm3 = vcmp.ge.s32.totalorder %v1687_v21, 2  ;;  %vm1707_vm4 = vcmp.lt.s32.totalorder %v1687_v21, 18  ;;  %v4106_v21 = vld [vmem:[#allocation4 + $0x298] sm:$0xff]  }
 0x299   : > { %v1640_v57 = vadd.f32 %v4965_v35, %v1612_v39  ;;  %v1615_v7 = vadd.f32 %v3709_v44, %v1391_v8  ;;  %v1423_v8 = vadd.f32 %v3681_v62, %v4961_v11  ;;  %v1415_v11 = vadd.f32 %v1414_v10, %v4963_v41  ;;  %vm5050_vm8 = vmand %vm1697_vm3, %vm1707_vm4  ;;  %v4112_v10 = vld [vmem:[#allocation4 + $0x280] sm:$0xff]  }
 0x29a   : > { %v4174_v24 = vpop.eup %4173  ;;  %v1560_v45 = vpop.f32.mrf.mxu1  ;;  %vm1698_vm6 = vcmp.ge.s32.totalorder %v1688_v19, 2  ;;  %vm1708_vm7 = vcmp.lt.s32.totalorder %v1688_v19, 18 }
 0x29b   : > { %v4176_v17 = vpop.eup %4175  ;;  %v1643_v46 = vadd.f32 %v4965_v35, %v1615_v7  ;;  %v1613_v47 = vadd.f32 %v1560_v45, %v1383_v63  ;;  %v1673_v25 = vpack.c.bf16 %v4174_v24, %v4172_v31  ;;  %4187 = vtanh.f32 %v1640_v57  ;;  %v4093_v24 = vld [vmem:[#allocation4 + $0x228] sm:$0xff]   ;;  %vm5055_vm9 = vmand %vm1698_vm6, %vm1708_vm7 }
 0x29c   : > { %v4178_v36 = vpop.eup %4177  ;;  %v3712_v40 = vpop.f32.mrf.mxu1 }
 0x29d   : > { %v1641_v50 = vadd.f32 %v4965_v35, %v1613_v47  ;;  %3734 = vmatprep.mubr.msk.bf16.mxu0 %vm4989_vm10, %v1673_v25  ;;  %v1672_v51 = vpack.c.bf16 %v4178_v36, %v4176_v17  ;;  %4189 = vtanh.f32 %v1643_v46  ;;  %v1618_v38 = vadd.f32 %v3712_v40, %v1404_v13  ;;  %v4094_v40 = vld [vmem:[#allocation4 + $0x220] sm:$0xff]  }
 0x29e   : > { %v1573_v55 = vpop.f32.mrf.mxu1  ;;  %v1689_v36 = vadd.s32 6, %v4975_v16 }
 0x29f   : > { %4191 = vtanh.f32 %v1641_v50  ;;  %v1616_v58 = vadd.f32 %v1573_v55, %v1396_v49  ;;  %3766 = vmatprep.mubr.msk.bf16.mxu1 %vm1713_vm11, %v1672_v51  ;;  %v1646_v26 = vadd.f32 %v4965_v35, %v1618_v38  ;;  %v4095_v49 = vld [vmem:[#allocation4 + $0x218] sm:$0xff]   ;;  %v4096_v38 = vld [vmem:[#allocation4 + $0x210] sm:$0xff]  }
 0x2a0   : > { %4193 = vtanh.f32 %v1642_v34  ;;  %v3713_v59 = vpop.f32.mrf.mxu1  ;;  %3767 = vmatmul.mubr.msk.bf16.vlgmr.msra.gmra.mxu1 %vm4989_vm10, %v1673_v25  ;;  %v4180_v61 = vpop.eup %4179  ;;  %vm1699_vm10 = vcmp.ge.s32.totalorder %v1689_v36, 2  ;;  %vm1709_vm11 = vcmp.lt.s32.totalorder %v1689_v36, 18 }
 0x2a1   : > { %v1644_v37 = vadd.f32 %v4965_v35, %v1616_v58  ;;  %v1619_v52 = vadd.f32 %v3713_v59, %v1407_v14  ;;  %vm5069_vm14 = vmand %vm1699_vm10, %vm1709_vm11  ;;  %v1691_v14 = vadd.s32 8, %v4975_v16 }
 0x2a2   : > { %v1576_v1 = vpop.f32.mrf.mxu1  ;;  %v4182_v27 = vpop.eup %4181 }
 0x2a3   : > { %v1647_v3 = vadd.f32 %v4965_v35, %v1619_v52  ;;  %v1617_v9 = vadd.f32 %v1576_v1, %v1399_v60  ;;  %4195 = vtanh.f32 %v1644_v37  ;;  %vm1701_vm3 = vcmp.ge.s32.totalorder %v1691_v14, 2  ;;  %v4097_v37 = vld [vmem:[#allocation4 + $0x208] sm:$0xff]  }
 0x2a4   : > { %v4184_v4 = vpop.eup %4183  ;;  %v3716_v42 = vpop.f32.mrf.mxu1  ;;  %vm1711_vm4 = vcmp.lt.s32.totalorder %v1691_v14, 18 }
 0x2a5   : > { %v4186_v22 = vpop.eup %4185  ;;  %v5020_v23 = vpack.c.bf16 %v4184_v4, %v4180_v61  ;;  %v1645_v33 = vadd.f32 %v4965_v35, %v1617_v9  ;;  %v1622_v30 = vadd.f32 %v3716_v42, %v1420_v2  ;;  %4197 = vtanh.f32 %v1647_v3  ;;  %vm5086_vm6 = vmand %vm1701_vm3, %vm1711_vm4  ;;  %v4098_v2 = vld [vmem:[#allocation4 + $0x200] sm:$0xff]   ;;  %v4099_v9 = vld [vmem:[#allocation4 + $0x2b8] sm:$0xff]  }
 0x2a6   : > { %v1589_v18 = vpop.f32.mrf.mxu1  ;;  %v5029_v29 = vpack.c.bf16 %v4182_v27, %v4186_v22  ;;  %v1692_v3 = vadd.s32 9, %v4975_v16  ;;  %3814 = vmatprep.subr.bf16.mxu1 %v4099_v9  ;;  %v4100_v4 = vld [vmem:[#allocation4 + $0x2b0] sm:$0xff]   ;;  %v4104_v42 = vld [vmem:[#allocation4 + $0x2a0] sm:$0xff]  }
 0x2a7   : > { %4199 = vtanh.f32 %v1645_v33  ;;  %v1650_v39 = vadd.f32 %v4965_v35, %v1622_v30  ;;  %v1620_v43 = vadd.f32 %v1589_v18, %v1412_v15  ;;  %3735 = vmatmul.mubr.msk.bf16.vlgmr.msra.gmra.mxu0 %vm5015_vm0, %v5020_v23  ;;  %3770 = vmatprep.mubr.msk.bf16.mxu1 %vm5015_vm0, %v5020_v23  ;;  %v4101_v15 = vld [vmem:[#allocation4 + $0x278] sm:$0xff]   ;;  %v4103_v16 = vld [vmem:[#allocation4 + $0x270] sm:$0xff]   ;;  %v4107_v22 = vld [vmem:[#allocation4 + $0x260] sm:$0xff]  }
 0x2a8   : > { %4201 = vtanh.f32 %v1646_v26  ;;  %v3717_v44 = vpop.f32.mrf.mxu1  ;;  %3738 = vmatprep.mubr.msk.bf16.mxu0 %vm5025_vm1, %v5029_v29  ;;  %3771 = vmatmul.mubr.msk.bf16.gmra.mxu1 %vm5025_vm1, %v5029_v29  ;;  %v4188_v63 = vpop.eup %4187  ;;  %vm1712_vm7 = vcmp.lt.s32.totalorder %v1692_v3, 18  ;;  %v4102_v26 = vld [vmem:[#allocation4 + $0x2a8] sm:$0xff]   ;;  %v4109_v33 = vld [vmem:[#allocation4 + $0x258] sm:$0xff]  }
 0x2a9   : > { %v1623_v31 = vadd.f32 %v3717_v44, %v1423_v8  ;;  %3783 = vmatpush3.bf16.msra.mxu0 %v4940_v6  ;;  %v1648_v57 = vadd.f32 %v4965_v35, %v1620_v43  ;;  %4203 = vtanh.f32 %v1650_v39  ;;  %3815 = vmatpush3.bf16.msra.mxu1 %v4099_v9  ;;  %v4110_v30 = vld [vmem:[#allocation4 + $0x288] sm:$0xff]  }
 0x2aa   : > { %v1592_v7 = vpop.f32.mrf.mxu1  ;;  %3784 = vmatprep.subr.bf16.mxu0 %v4092_v28  ;;  %v4190_v0 = vpop.eup %4189  ;;  %3816 = vmatprep.subr.bf16.mxu1 %v4100_v4  ;;  %v4113_v18 = vld [vmem:[#allocation4 + $0x248] sm:$0xff]  }
 0x2ab   : > { %v1651_v45 = vadd.f32 %v4965_v35, %v1623_v31  ;;  %v1621_v32 = vadd.f32 %v1592_v7, %v1415_v11 }
 0x2ac   : > { %v4192_v17 = vpop.eup %4191 }
 0x2ad   : > { %v4194_v6 = vpop.eup %4193  ;;  %4205 = vtanh.f32 %v1651_v45  ;;  %v1649_v46 = vadd.f32 %v4965_v35, %v1621_v32  ;;  %3785 = vmatpush3.bf16.msra.mxu0 %v4092_v28  ;;  %v1676_v47 = vpack.c.bf16 %v4192_v17, %v4188_v63  ;;  %3817 = vmatpush3.bf16.msra.mxu1 %v4100_v4  ;;  %v4115_v28 = vld [vmem:[#allocation4 + $0x240] sm:$0xff]  }
 0x2ae   : > { %4207 = vtanh.f32 %v1648_v57  ;;  %3786 = vmatprep.subr.bf16.mxu0 %v4093_v24  ;;  %v1677_v34 = vpack.c.bf16 %v4190_v0, %v4194_v6  ;;  %3818 = vmatprep.subr.bf16.mxu1 %v4102_v26 }
 0x2af   : > { %4209 = vtanh.f32 %v1649_v46  ;;  %3739 = vmatmul.mubr.msk.bf16.gmra.mxu0 %vm5050_vm8, %v1676_v47  ;;  %3774 = vmatprep.mubr.msk.bf16.mxu1 %vm5050_vm8, %v1676_v47 }
 0x2b0   : > { %3742 = vmatprep.mubr.msk.bf16.mxu0 %vm5055_vm9, %v1677_v34  ;;  %3775 = vmatmul.mubr.msk.bf16.gmra.mxu1 %vm5055_vm9, %v1677_v34  ;;  %v4196_v35 = vpop.eup %4195 }
 0x2b1   : > { %3787 = vmatpush3.bf16.msra.mxu0 %v4093_v24  ;;  %3819 = vmatpush3.bf16.msra.mxu1 %v4102_v26 }
 0x2b2   : > { %3788 = vmatprep.subr.bf16.mxu0 %v4094_v40  ;;  %v4198_v50 = vpop.eup %4197  ;;  %3820 = vmatprep.subr.bf16.mxu1 %v4104_v42 }
 0x2b4   : > { %v4200_v51 = vpop.eup %4199 }
 0x2b5   : > { %v4202_v54 = vpop.eup %4201  ;;  %3789 = vmatpush3.bf16.msra.mxu0 %v4094_v40  ;;  %v1678_v55 = vpack.c.bf16 %v4200_v51, %v4196_v35  ;;  %3821 = vmatpush3.bf16.msra.mxu1 %v4104_v42 }
 0x2b6   : > { %3790 = vmatprep.subr.bf16.mxu0 %v4095_v49  ;;  %v1679_v58 = vpack.c.bf16 %v4198_v50, %v4202_v54  ;;  %v4204_v59 = vpop.eup %4203  ;;  %3822 = vmatprep.subr.bf16.mxu1 %v4106_v21  ;;  %v5122_v54 = vld [vmem:[#allocation7 + $0x2] ss:$0 sm:$0xff] }
 0x2b7   : > { %3743 = vmatmul.mubr.msk.bf16.gmra.mxu0 %vm5069_vm14, %v1678_v55  ;;  %3778 = vmatprep.mubr.msk.bf16.mxu1 %vm5069_vm14, %v1678_v55 }
 0x2b8   : > { %3746 = vmatprep.mubr.msk.bf16.mxu0 %vm5073_vm15, %v1679_v58  ;;  %3779 = vmatmul.mubr.msk.bf16.gmra.mxu1 %vm5073_vm15, %v1679_v58 }
 0x2b9   : > { %3791 = vmatpush3.bf16.msra.mxu0 %v4095_v49  ;;  %3823 = vmatpush3.bf16.msra.mxu1 %v4106_v21 }
 0x2ba   : > { %v4206_v60 = vpop.eup %4205  ;;  %3792 = vmatprep.subr.bf16.mxu0 %v4096_v38 }
 0x2bb   : > { %v4208_v52 = vpop.eup %4207  ;;  %v1681_v61 = vpack.c.bf16 %v4206_v60, %v4204_v59 }
 0x2bc   : > { %v4210_v62 = vpop.eup %4209 }
 0x2bd   : > { %3793 = vmatpush3.bf16.msra.mxu0 %v4096_v38  ;;  %v1680_v27 = vpack.c.bf16 %v4210_v62, %v4208_v52 }
 0x2be   : > { %3794 = vmatprep.subr.bf16.mxu0 %v4097_v37 }
 0x2bf   : > { %3747 = vmatmul.mubr.msk.bf16.gmra.mxu0 %vm5086_vm6, %v1680_v27 }
 0x2c0   : > { %3798 = vmatprep.mubr.msk.bf16.mxu0 %vm5015_vm0, %v5020_v23  ;;  %vm1702_vm0 = vcmp.ge.s32.totalorder %v1692_v3, 2  ;;  %v4108_v23 = vld [vmem:[#allocation4 + $0x290] sm:$0xff]  }
 0x2c1   : > { %3795 = vmatpush3.bf16.msra.mxu0 %v4097_v37  ;;  %3824 = vmatprep.subr.bf16.mxu1 %v4108_v23 }
 0x2c2   : > { %3796 = vmatprep.subr.bf16.mxu0 %v4098_v2  ;;  %3825 = vmatpush3.bf16.msra.mxu1 %v4108_v23 }
 0x2c3   : > { %3826 = vmatprep.subr.bf16.mxu1 %v4110_v30 }
 0x2c5   : > { %3797 = vmatpush3.bf16.msra.mxu0 %v4098_v2 }
 0x2c6   : > { %3846 = vmatprep.subr.bf16.mxu0 %v4101_v15  ;;  %3827 = vmatpush3.bf16.msra.mxu1 %v4110_v30 }
 0x2c7   : > { %3828 = vmatprep.subr.bf16.mxu1 %v4112_v10 }
 0x2c8   : > { %3799 = vmatmul.mubr.msk.bf16.vlgmr.msra.gmra.mxu0 %vm5025_vm1, %v5029_v29  ;;  %vm1722_vm1 = vmand %vm1702_vm0, %vm1712_vm7  ;;  %v5109_v29 = vld [vmem:[#allocation4 + $0x2f8] sm:$0xff]  }
 0x2c9   : > { %3802 = vmatprep.mubr.msk.bf16.mxu0 %vm5050_vm8, %v1676_v47  ;;  %3847 = vmatpush3.bf16.msra.mxu0 %v4101_v15 }
 0x2ca   : > { %3848 = vmatprep.subr.bf16.mxu0 %v4103_v16  ;;  %3829 = vmatpush3.bf16.msra.mxu1 %v4112_v10 }
 0x2cb   : > { %3878 = vmatprep.subr.bf16.mxu1 %v5109_v29 }
 0x2cd   : > { %3849 = vmatpush3.bf16.msra.mxu0 %v4103_v16 }
 0x2ce   : > { %3850 = vmatprep.subr.bf16.mxu0 %v4105_v20 }
 0x2d0   : > { %3803 = vmatmul.mubr.msk.bf16.gmra.mxu0 %vm5055_vm9, %v1677_v34 }
 0x2d1   : > { %3806 = vmatprep.mubr.msk.bf16.mxu0 %vm5069_vm14, %v1678_v55  ;;  %3851 = vmatpush3.bf16.msra.mxu0 %v4105_v20 }
 0x2d2   : > { %3852 = vmatprep.subr.bf16.mxu0 %v4107_v22 }
 0x2d5   : > { %3853 = vmatpush3.bf16.msra.mxu0 %v4107_v22 }
 0x2d6   : > { %3854 = vmatprep.subr.bf16.mxu0 %v4109_v33 }
 0x2d8   : > { %3807 = vmatmul.mubr.msk.bf16.gmra.mxu0 %vm5073_vm15, %v1679_v58 }
 0x2d9   : > { %3810 = vmatprep.mubr.msk.bf16.mxu0 %vm5086_vm6, %v1680_v27  ;;  %3855 = vmatpush3.bf16.msra.mxu0 %v4109_v33 }
 0x2da   : > { %3856 = vmatprep.subr.bf16.mxu0 %v4111_v12 }
 0x2dd   : > { %3857 = vmatpush3.bf16.msra.mxu0 %v4111_v12 }
 0x2de   : > { %3858 = vmatprep.subr.bf16.mxu0 %v4113_v18 }
 0x2e0   : > { %3811 = vmatmul.mubr.msk.bf16.gmra.mxu0 %vm1722_vm1, %v1681_v61 }
 0x2e1   : > { %3859 = vmatpush3.bf16.msra.mxu0 %v4113_v18 }
 0x2e2   : > { %3860 = vmatprep.subr.bf16.mxu0 %v4115_v28 }
 0x2e5   : > { %3861 = vmatpush3.bf16.msra.mxu0 %v4115_v28 }
 0x360   : > { %v3768_v8 = vpop.f32.mrf.mxu1 }
 0x362   : > { %v2014_v44 = vpop.f32.mrf.mxu1 }
 0x364   : > { %v3769_v63 = vpop.f32.mrf.mxu1 }
 0x366   : > { %v2017_v24 = vpop.f32.mrf.mxu1 }
 0x367   : > { %v3736_v19 = vpop.f32.mrf.mxu0 }
 0x368   : > { %v3772_v32 = vpop.f32.mrf.mxu1  ;;  %v2023_v35 = vadd.f32 %v3768_v8, %v3736_v19 }
 0x369   : > { %v1869_v39 = vpop.f32.mrf.mxu0 }
 0x36a   : > { %v2030_v6 = vpop.f32.mrf.mxu1  ;;  %v2015_v51 = vadd.f32 %v2014_v44, %v1869_v39 }
 0x36b   : > { %v3737_v43 = vpop.f32.mrf.mxu0 }
 0x36c   : > { %v3773_v25 = vpop.f32.mrf.mxu1  ;;  %v2026_v56 = vadd.f32 %v3769_v63, %v3737_v43 }
 0x36d   : > { %v1872_v11 = vpop.f32.mrf.mxu0 }
 0x36e   : > { %v2033_v40 = vpop.f32.mrf.mxu1  ;;  %v2018_v60 = vadd.f32 %v2017_v24, %v1872_v11 }
 0x36f   : > { %v3740_v31 = vpop.f32.mrf.mxu0 }
 0x370   : > { %v3776_v49 = vpop.f32.mrf.mxu1  ;;  %v2039_v62 = vadd.f32 %v3772_v32, %v3740_v31 }
 0x371   : > { %v1885_v57 = vpop.f32.mrf.mxu0 }
 0x372   : > { %v2046_v58 = vpop.f32.mrf.mxu1  ;;  %v2031_v9 = vadd.f32 %v2030_v6, %v1885_v57 }
 0x373   : > { %v3741_v7 = vpop.f32.mrf.mxu0 }
 0x374   : > { %v3777_v2 = vpop.f32.mrf.mxu1  ;;  %v2042_v16 = vadd.f32 %v3773_v25, %v3741_v7 }
 0x375   : > { %v1888_v0 = vpop.f32.mrf.mxu0 }
 0x376   : > { %v2049_v20 = vpop.f32.mrf.mxu1  ;;  %v2034_v23 = vadd.f32 %v2033_v40, %v1888_v0 }
 0x377   : > { %v3744_v45 = vpop.f32.mrf.mxu0 }
 0x378   : > { %v2055_v10 = vadd.f32 %v3776_v49, %v3744_v45  ;;  %v3780_v19 = vpop.f32.mrf.mxu1 }
 0x379   : > { %v1901_v17 = vpop.f32.mrf.mxu0 }
 0x37a   : > { %v2047_v39 = vadd.f32 %v2046_v58, %v1901_v17  ;;  %v2062_v57 = vpop.f32.mrf.mxu1 }
 0x37b   : > { %v3745_v41 = vpop.f32.mrf.mxu0 }
 0x37c   : > { %v2058_v31 = vadd.f32 %v3777_v2, %v3745_v41 }
 0x37d   : > { %v5112_v46 = vpop.f32.mrf.mxu0 }
 0x37e   : > { %v2050_v45 = vadd.f32 %v2049_v20, %v5112_v46  ;;  %v4117_v20 = vld [vmem:[#allocation4 + $0x2e8] sm:$0xff]  }
 0x37f   : > { %v5114_v47 = vpop.f32.mrf.mxu0 }
 0x381   : > { %v5116_v36 = vpop.f32.mrf.mxu0 }
 0x383   : > { %v5118_v34 = vpop.f32.mrf.mxu0 }
 0x385   : > { %v5120_v48 = vpop.f32.mrf.mxu0 }
 0x388   : > { %v3800_v50 = vpop.f32.mrf.mxu0 }
 0x389   : > { %v2241_v13 = vadd.f32 %v3800_v50, %v2023_v35  ;;  %v2071_v35 = vadd.f32 %v3780_v19, %v5114_v47  ;;  %v4116_v47 = vld [vmem:[#allocation4 + $0x2f0] sm:$0xff]  }
 0x38a   : > { %v2176_v55 = vpop.f32.mrf.mxu0 }
 0x38b   : > { %v2239_v14 = vadd.f32 %v2176_v55, %v2015_v51  ;;  %v2265_v38 = vadd.f32 %v5122_v54, %v2241_v13  ;;  %v3781_v13 = vpop.f32.mrf.mxu1  ;;  %v2063_v55 = vadd.f32 %v2062_v57, %v5116_v36  ;;  %v4119_v57 = vld [vmem:[#allocation4 + $0x2d8] sm:$0xff]  }
 0x38c   : > { %v3801_v59 = vpop.f32.mrf.mxu0 }
 0x38d   : > { %v2242_v37 = vadd.f32 %v3801_v59, %v2026_v56  ;;  %v2263_v52 = vadd.f32 %v5122_v54, %v2239_v14  ;;  %4211 = vtanh.f32 %v2265_v38 }
 0x38e   : > { %v2179_v61 = vpop.f32.mrf.mxu0 }
 0x38f   : > { %v2266_v1 = vadd.f32 %v5122_v54, %v2242_v37  ;;  %v2240_v27 = vadd.f32 %v2179_v61, %v2018_v60  ;;  %v2074_v60 = vadd.f32 %v3781_v13, %v5118_v34 }
 0x390   : > { %v3804_v3 = vpop.f32.mrf.mxu0 }
 0x391   : > { %4213 = vtanh.f32 %v2266_v1  ;;  %v2264_v4 = vadd.f32 %v5122_v54, %v2240_v27  ;;  %v2245_v15 = vadd.f32 %v3804_v3, %v2039_v62 }
 0x392   : > { %4215 = vtanh.f32 %v2263_v52  ;;  %v2192_v26 = vpop.f32.mrf.mxu0  ;;  %v2065_v52 = vpop.f32.mrf.mxu1 }
 0x393   : > { %4217 = vtanh.f32 %v2264_v4  ;;  %v2243_v42 = vadd.f32 %v2192_v26, %v2031_v9  ;;  %v2269_v21 = vadd.f32 %v5122_v54, %v2245_v15  ;;  %v2066_v34 = vadd.f32 %v2065_v52, %v5120_v48 }
 0x394   : > { %v3805_v22 = vpop.f32.mrf.mxu0 }
 0x395   : > { %v2246_v33 = vadd.f32 %v3805_v22, %v2042_v16  ;;  %v2267_v30 = vadd.f32 %v5122_v54, %v2243_v42  ;;  %4219 = vtanh.f32 %v2269_v21 }
 0x396   : > { %v2195_v12 = vpop.f32.mrf.mxu0 }
 0x397   : > { %v2270_v18 = vadd.f32 %v5122_v54, %v2246_v33  ;;  %v2244_v28 = vadd.f32 %v2195_v12, %v2034_v23 }
 0x398   : > { %v3808_v8 = vpop.f32.mrf.mxu0 }
 0x399   : > { %4221 = vtanh.f32 %v2270_v18  ;;  %v2268_v43 = vadd.f32 %v5122_v54, %v2244_v28  ;;  %v2249_v44 = vadd.f32 %v3808_v8, %v2055_v10  ;;  %v4118_v28 = vld [vmem:[#allocation4 + $0x2e0] sm:$0xff]  }
 0x39a   : > { %4223 = vtanh.f32 %v2267_v30  ;;  %v2208_v11 = vpop.f32.mrf.mxu0  ;;  %v4212_v0 = vpop.eup %4211 }
 0x39b   : > { %4225 = vtanh.f32 %v2268_v43  ;;  %v2247_v63 = vadd.f32 %v2208_v11, %v2047_v39  ;;  %v2273_v7 = vadd.f32 %v5122_v54, %v2249_v44 }
 0x39c   : > { %v3809_v24 = vpop.f32.mrf.mxu0 }
 0x39d   : > { %v2250_v32 = vadd.f32 %v3809_v24, %v2058_v31  ;;  %v2271_v17 = vadd.f32 %v5122_v54, %v2247_v63  ;;  %4227 = vtanh.f32 %v2273_v7 }
 0x39e   : > { %v4214_v6 = vpop.eup %4213  ;;  %v2211_v25 = vpop.f32.mrf.mxu0 }
 0x39f   : > { %v4216_v40 = vpop.eup %4215  ;;  %v2274_v49 = vadd.f32 %v5122_v54, %v2250_v32  ;;  %v2248_v41 = vadd.f32 %v2211_v25, %v2050_v45  ;;  %v5137_v50 = vpack.c.bf16 %v4214_v6, %v4212_v0 }
 0x3a0   : > { %v4218_v51 = vpop.eup %4217  ;;  %v3812_v56 = vpop.f32.mrf.mxu0 }
 0x3a1   : > { %4229 = vtanh.f32 %v2274_v49  ;;  %v2272_v46 = vadd.f32 %v5122_v54, %v2248_v41  ;;  %v2253_v14 = vadd.f32 %v3812_v56, %v2071_v35  ;;  %v5141_v58 = vpack.c.bf16 %v4218_v51, %v4216_v40  ;;  %v4120_v40 = vld [vmem:[#allocation4 + $0x2d0] sm:$0xff]  }
 0x3a2   : > { %4231 = vtanh.f32 %v2271_v17  ;;  %v2224_v38 = vpop.f32.mrf.mxu0  ;;  %v2311_v59 = vshrl.u32 %v5137_v50, 16  ;;  %v2314_v27 = vshll.u32 %v5137_v50, 16  ;;  %v4220_v2 = vpop.eup %4219 }
 0x3a3   : > { %4233 = vtanh.f32 %v2272_v46  ;;  %v2251_v37 = vadd.f32 %v2224_v38, %v2063_v55  ;;  %3830 = vmatprep.mubr.bf16.mxu1 %v5141_v58  ;;  %v2304_v36 = vshrl.u32 %v5141_v58, 16  ;;  %v2277_v61 = vadd.f32 %v5122_v54, %v2253_v14  ;;  %v4121_v38 = vld [vmem:[#allocation4 + $0x2c8] sm:$0xff]  }
 0x3a4   : > { %v3813_v62 = vpop.f32.mrf.mxu0  ;;  %3831 = vmatmul.mubr.bf16.vlgmr.msra.gmra.mxu1 %v5137_v50  ;;  %v2313_v1 = vrot.slane %v2311_v59, 7  ;;  %v2307_v4 = vshll.u32 %v5141_v58, 16  ;;  %v2377_v58 = vrot.slane %v2314_v27, 1 }
 0x3a5   : > { %v2254_v3 = vadd.f32 %v3813_v62, %v2074_v60  ;;  %3879 = vmatpush3.bf16.msra.mxu1 %v5109_v29  ;;  %v2306_v9 = vrot.slane %v2304_v36, 7  ;;  %v2275_v26 = vadd.f32 %v5122_v54, %v2251_v37  ;;  %4235 = vtanh.f32 %v2277_v61 }
 0x3a6   : > { %v4222_v15 = vpop.eup %4221  ;;  %v2227_v16 = vpop.f32.mrf.mxu0  ;;  %3880 = vmatprep.subr.bf16.mxu1 %v4116_v47  ;;  %v2316_v42 = vor.u32 %v2314_v27, %v2313_v1  ;;  %v2375_v51 = vrot.slane %v2307_v4, 1 }
 0x3a7   : > { %v4224_v21 = vpop.eup %4223  ;;  %v2278_v48 = vadd.f32 %v5122_v54, %v2254_v3  ;;  %v2252_v22 = vadd.f32 %v2227_v16, %v2066_v34  ;;  %v2309_v23 = vor.u32 %v2307_v4, %v2306_v9  ;;  %v5161_v33 = vpack.c.bf16 %v4222_v15, %v4220_v2  ;;  %v4122_v3 = vld [vmem:[#allocation4 + $0x2c0] sm:$0xff]  }
 0x3a8   : > { %v4226_v29 = vpop.eup %4225  ;;  %v2368_v18 = vsel %vm4801_vm2, 0, %v2316_v42  ;;  %v2376_v61 = vor.u32 %v2375_v51, %v2304_v36 }
 0x3a9   : > { %4237 = vtanh.f32 %v2278_v48  ;;  %v2276_v30 = vadd.f32 %v5122_v54, %v2252_v22  ;;  %3881 = vmatpush3.bf16.msra.mxu1 %v4116_v47  ;;  %v2367_v12 = vsel %vm4801_vm2, 0, %v2309_v23  ;;  %v5166_v10 = vpack.c.bf16 %v4226_v29, %v4224_v21 }
 0x3aa   : > { %4239 = vtanh.f32 %v2275_v26  ;;  %3862 = vmatprep.mubr.bf16.mxu0 %v2367_v12  ;;  %3882 = vmatprep.subr.bf16.mxu1 %v4117_v20  ;;  %v2325_v19 = vshrl.u32 %v5161_v33, 16  ;;  %v2328_v39 = vshll.u32 %v5161_v33, 16  ;;  %v4228_v43 = vpop.eup %4227  ;;  %v2399_v36 = vsel %vm4886_vm5, %v2376_v61, 0  ;;  %v5252_v61 = vld [vmem:[#allocation7 + $0x3] ss:$0 sm:$0xff] }
 0x3ab   : > { %4241 = vtanh.f32 %v2276_v30  ;;  %3834 = vmatprep.mubr.bf16.mxu1 %v5166_v10  ;;  %3863 = vmatmul.mubr.bf16.vlgmr.msra.gmra.mxu0 %v2368_v18  ;;  %v2318_v54 = vshrl.u32 %v5166_v10, 16  ;;  %v2321_v11 = vshll.u32 %v5166_v10, 16  ;;  %v2378_v48 = vor.u32 %v2377_v58, %v2311_v59 }
 0x3ac   : > { %3835 = vmatmul.mubr.bf16.gmra.mxu1 %v5161_v33  ;;  %v2327_v8 = vrot.slane %v2325_v19, 7  ;;  %v2381_v30 = vrot.slane %v2328_v39, 1 }
 0x3ad   : > { %3883 = vmatpush3.bf16.msra.mxu1 %v4117_v20  ;;  %v2320_v44 = vrot.slane %v2318_v54, 7  ;;  %v2379_v26 = vrot.slane %v2321_v11, 1  ;;  %v2400_v29 = vsel %vm4886_vm5, %v2378_v48, 0 }
 0x3ae   : > { %v4230_v31 = vpop.eup %4229  ;;  %3884 = vmatprep.subr.bf16.mxu1 %v4118_v28  ;;  %v2330_v63 = vor.u32 %v2328_v39, %v2327_v8  ;;  %v2382_v12 = vor.u32 %v2381_v30, %v2325_v19 }
 0x3af   : > { %v4232_v7 = vpop.eup %4231  ;;  %v2323_v24 = vor.u32 %v2321_v11, %v2320_v44  ;;  %v5182_v0 = vpack.c.bf16 %v4230_v31, %v4228_v43  ;;  %v2380_v22 = vor.u32 %v2379_v26, %v2318_v54 }
 0x3b0   : > { %v4234_v45 = vpop.eup %4233  ;;  %v2370_v25 = vsel %vm4801_vm2, 0, %v2330_v63  ;;  %v2402_v53 = vsel %vm4886_vm5, %v2382_v12, 0 }
 0x3b1   : > { %3885 = vmatpush3.bf16.msra.mxu1 %v4118_v28  ;;  %v2369_v32 = vsel %vm4801_vm2, 0, %v2323_v24  ;;  %v5186_v6 = vpack.c.bf16 %v4234_v45, %v4232_v7  ;;  %v2339_v17 = vshrl.u32 %v5182_v0, 16  ;;  %v2342_v41 = vshll.u32 %v5182_v0, 16 }
 0x3b2   : > { %3866 = vmatprep.mubr.bf16.mxu0 %v2369_v32  ;;  %3886 = vmatprep.subr.bf16.mxu1 %v4119_v57  ;;  %v4236_v13 = vpop.eup %4235  ;;  %v2401_v50 = vsel %vm4886_vm5, %v2380_v22, 0 }
 0x3b3   : > { %3838 = vmatprep.mubr.bf16.mxu1 %v5186_v6  ;;  %3867 = vmatmul.mubr.bf16.gmra.mxu0 %v2370_v25  ;;  %v2332_v35 = vshrl.u32 %v5186_v6, 16  ;;  %v2341_v49 = vrot.slane %v2339_v17, 7  ;;  %v2335_v56 = vshll.u32 %v5186_v6, 16  ;;  %v2385_v18 = vrot.slane %v2342_v41, 1 }
 0x3b4   : > { %3839 = vmatmul.mubr.bf16.gmra.mxu1 %v5182_v0 }
 0x3b5   : > { %3887 = vmatpush3.bf16.msra.mxu1 %v4119_v57  ;;  %v2334_v55 = vrot.slane %v2332_v35, 7  ;;  %v2344_v14 = vor.u32 %v2342_v41, %v2341_v49  ;;  %v2383_v59 = vrot.slane %v2335_v56, 1  ;;  %v2386_v8 = vor.u32 %v2385_v18, %v2339_v17 }
 0x3b6   : > { %v4238_v46 = vpop.eup %4237  ;;  %3888 = vmatprep.subr.bf16.mxu1 %v4120_v40 }
 0x3b7   : > { %v4240_v47 = vpop.eup %4239  ;;  %v2337_v60 = vor.u32 %v2335_v56, %v2334_v55  ;;  %v2302_v37 = vpack.c.bf16 %v4238_v46, %v4236_v13  ;;  %v2372_v34 = vsel %vm4801_vm2, 0, %v2344_v14  ;;  %v2384_v10 = vor.u32 %v2383_v59, %v2332_v35 }
 0x3b8   : > { %v4242_v52 = vpop.eup %4241  ;;  %v2404_v43 = vsel %vm4886_vm5, %v2386_v8, 0 }
 0x3b9   : > { %3889 = vmatpush3.bf16.msra.mxu1 %v4120_v40  ;;  %v2371_v62 = vsel %vm4801_vm2, 0, %v2337_v60  ;;  %v2301_v1 = vpack.c.bf16 %v4242_v52, %v4240_v47  ;;  %v2353_v2 = vshrl.u32 %v2302_v37, 16  ;;  %v2356_v15 = vshll.u32 %v2302_v37, 16 }
 0x3ba   : > { %3870 = vmatprep.mubr.bf16.mxu0 %v2371_v62  ;;  %3890 = vmatprep.subr.bf16.mxu1 %v4121_v38  ;;  %v2403_v28 = vsel %vm4886_vm5, %v2384_v10, 0  ;;  %v4275_v62 = vld [vmem:[%s4719_s2 + $0x18] sm:$0xff]   ;;  %v4277_v10 = vld [vmem:[%s4719_s2 + $0x28] sm:$0xff]  }
 0x3bb   : > { %3842 = vmatprep.mubr.bf16.mxu1 %v2301_v1  ;;  %3871 = vmatmul.mubr.bf16.gmra.mxu0 %v2372_v34  ;;  %v2346_v9 = vshrl.u32 %v2301_v1, 16  ;;  %v2355_v4 = vrot.slane %v2353_v2, 7  ;;  %v2349_v42 = vshll.u32 %v2301_v1, 16  ;;  %v2389_v33 = vrot.slane %v2356_v15, 1 }
 0x3bc   : > { %3843 = vmatmul.mubr.bf16.gmra.mxu1 %v2302_v37  ;;  %v2935_v1 = vunpack.c.l.bf16 %v4275_v62 }
 0x3bd   : > { %3891 = vmatpush3.bf16.msra.mxu1 %v4121_v38  ;;  %3894 = vmatprep.mubr.bf16.mxu1 %v2399_v36  ;;  %v2348_v16 = vrot.slane %v2346_v9, 7  ;;  %v2358_v20 = vor.u32 %v2356_v15, %v2355_v4  ;;  %v2387_v54 = vrot.slane %v2349_v42, 1  ;;  %v2390_v44 = vor.u32 %v2389_v33, %v2353_v2  ;;  %v4276_v4 = vld [vmem:[%s4719_s2 + $0x10] sm:$0xff]   ;;  %v4278_v33 = vld [vmem:[%s4719_s2 + $0x20] sm:$0xff]  }
 0x3be   : > { %3892 = vmatprep.subr.bf16.mxu1 %v4122_v3  ;;  %v2933_v58 = vunpack.c.l.bf16 %v4276_v4 }
 0x3bf   : > { %v2351_v21 = vor.u32 %v2349_v42, %v2348_v16  ;;  %v2374_v23 = vsel %vm4801_vm2, 0, %v2358_v20  ;;  %v2388_v39 = vor.u32 %v2387_v54, %v2346_v9  ;;  %v2406_v11 = vsel %vm4886_vm5, %v2390_v44, 0 }
 0x3c0   : > { %v2936_v16 = vunpack.c.h.bf16 %v4275_v62  ;;  %v4279_v62 = vld [vmem:[%s4719_s2 + $0x38] sm:$0xff]  }
 0x3c1   : > { %3893 = vmatpush3.bf16.msra.mxu1 %v4122_v3  ;;  %v2373_v27 = vsel %vm4801_vm2, 0, %v2351_v21  ;;  %v2405_v19 = vsel %vm4886_vm5, %v2388_v39, 0 }
 0x3c2   : > { %3874 = vmatprep.mubr.bf16.mxu0 %v2373_v27 }
 0x3c3   : > { %3875 = vmatmul.mubr.bf16.gmra.mxu0 %v2374_v23  ;;  %v2934_v23 = vunpack.c.h.bf16 %v4276_v4 }
 0x3c4   : > { %3895 = vmatmul.mubr.bf16.vlgmr.msra.gmra.mxu1 %v2400_v29 }
 0x3c5   : > { %3898 = vmatprep.mubr.bf16.mxu1 %v2401_v50 }
 0x3cc   : > { %3899 = vmatmul.mubr.bf16.gmra.mxu1 %v2402_v53  ;;  %v2939_v53 = vunpack.c.l.bf16 %v4277_v10 }
 0x3cd   : > { %3902 = vmatprep.mubr.bf16.mxu1 %v2403_v28 }
 0x3d4   : > { %3903 = vmatmul.mubr.bf16.gmra.mxu1 %v2404_v43 }
 0x3d5   : > { %3906 = vmatprep.mubr.bf16.mxu1 %v2405_v19  ;;  %v2937_v19 = vunpack.c.l.bf16 %v4278_v33 }
 0x3dc   : > { %3907 = vmatmul.mubr.bf16.gmra.mxu1 %v2406_v11 }
 0x464   : > { %v3832_v31 = vpop.f32.mrf.mxu1 }
 0x466   : > { %v2523_v63 = vpop.f32.mrf.mxu1 }
 0x468   : > { %v3833_v57 = vpop.f32.mrf.mxu1 }
 0x46a   : > { %v2526_v7 = vpop.f32.mrf.mxu1 }
 0x46b   : > { %v3864_v24 = vpop.f32.mrf.mxu0 }
 0x46c   : > { %v3836_v0 = vpop.f32.mrf.mxu1  ;;  %v2677_v37 = vadd.f32 %v3864_v24, %v3832_v31 }
 0x46d   : > { %v2668_v45 = vpop.f32.mrf.mxu0 }
 0x46e   : > { %v2539_v32 = vpop.f32.mrf.mxu1  ;;  %v2669_v2 = vadd.f32 %v2668_v45, %v2523_v63 }
 0x46f   : > { %v3865_v6 = vpop.f32.mrf.mxu0 }
 0x470   : > { %v3837_v17 = vpop.f32.mrf.mxu1  ;;  %v2680_v36 = vadd.f32 %v3865_v6, %v3833_v57 }
 0x471   : > { %v2671_v25 = vpop.f32.mrf.mxu0 }
 0x472   : > { %v2542_v40 = vpop.f32.mrf.mxu1  ;;  %v2672_v20 = vadd.f32 %v2671_v25, %v2526_v7  ;;  %v2940_v7 = vunpack.c.h.bf16 %v4277_v10  ;;  %v4281_v10 = vld [vmem:[%s4719_s2 + $0x48] sm:$0xff]  }
 0x473   : > { %v3868_v35 = vpop.f32.mrf.mxu0 }
 0x474   : > { %v5236_v49 = vpop.f32.mrf.mxu1  ;;  %v2693_v29 = vadd.f32 %v3868_v35, %v3836_v0  ;;  %v2938_v35 = vunpack.c.h.bf16 %v4278_v33  ;;  %v4282_v33 = vld [vmem:[%s4719_s2 + $0x40] sm:$0xff]  }
 0x475   : > { %v2684_v41 = vpop.f32.mrf.mxu0 }
 0x476   : > { %v5238_v5 = vpop.f32.mrf.mxu1  ;;  %v2685_v18 = vadd.f32 %v2684_v41, %v2539_v32 }
 0x477   : > { %v3869_v13 = vpop.f32.mrf.mxu0 }
 0x478   : > { %v5240_v51 = vpop.f32.mrf.mxu1  ;;  %v2696_v44 = vadd.f32 %v3869_v13, %v3837_v17 }
 0x479   : > { %v2687_v46 = vpop.f32.mrf.mxu0 }
 0x47a   : > { %v5242_v55 = vpop.f32.mrf.mxu1  ;;  %v2688_v24 = vadd.f32 %v2687_v46, %v2542_v40 }
 0x47b   : > { %v3872_v47 = vpop.f32.mrf.mxu0 }
 0x47c   : > { %v5244_v56 = vpop.f32.mrf.mxu1  ;;  %v2709_v17 = vadd.f32 %v3872_v47, %v5236_v49 }
 0x47d   : > { %v2700_v34 = vpop.f32.mrf.mxu0 }
 0x47e   : > { %v5246_v14 = vpop.f32.mrf.mxu1  ;;  %v2701_v40 = vadd.f32 %v2700_v34, %v5238_v5  ;;  %v2944_v34 = vunpack.c.h.bf16 %v4279_v62 }
 0x47f   : > { %v3873_v21 = vpop.f32.mrf.mxu0 }
 0x480   : > { %v5248_v38 = vpop.f32.mrf.mxu1  ;;  %v2712_v47 = vadd.f32 %v3873_v21, %v5240_v51 }
 0x481   : > { %v2703_v54 = vpop.f32.mrf.mxu0 }
 0x482   : > { %v5250_v60 = vpop.f32.mrf.mxu1 }
 0x483   : > { %v3876_v45 = vpop.f32.mrf.mxu0 }
 0x484   : > { %v3896_v52 = vpop.f32.mrf.mxu1 }
 0x485   : > { %v2895_v3 = vadd.f32 %v3896_v52, %v2677_v37 }
 0x486   : > { %v2830_v9 = vpop.f32.mrf.mxu1 }
 0x487   : > { %v2919_v15 = vadd.f32 %v5252_v61, %v2895_v3  ;;  %v2893_v26 = vadd.f32 %v2830_v9, %v2669_v2  ;;  %v2716_v2 = vpop.f32.mrf.mxu0 }
 0x488   : > { %v3897_v42 = vpop.f32.mrf.mxu1 }
 0x489   : > { %v2951_v48 = vadd.f32 %v2935_v1, %v2919_v15  ;;  %v2917_v22 = vadd.f32 %v5252_v61, %v2893_v26  ;;  %v2896_v27 = vadd.f32 %v3897_v42, %v2680_v36  ;;  %v2943_v1 = vunpack.c.l.bf16 %v4279_v62 }
 0x48a   : > { %v2833_v30 = vpop.f32.mrf.mxu1  ;;  %v2704_v42 = vadd.f32 %v2703_v54, %v5242_v55 }
 0x48b   : > { %4243 = vtanh.f32 %v2951_v48  ;;  %v2949_v50 = vadd.f32 %v2933_v58, %v2917_v22  ;;  %v2920_v59 = vadd.f32 %v5252_v61, %v2896_v27  ;;  %v2894_v12 = vadd.f32 %v2833_v30, %v2672_v20  ;;  %v4280_v58 = vld [vmem:[%s4719_s2 + $0x30] sm:$0xff]   ;;  %v3877_v48 = vpop.f32.mrf.mxu0 }
 0x48c   : > { %v3900_v28 = vpop.f32.mrf.mxu1  ;;  %v2941_v49 = vunpack.c.l.bf16 %v4280_v58 }
 0x48d   : > { %4245 = vtanh.f32 %v2949_v50  ;;  %v2952_v8 = vadd.f32 %v2936_v16, %v2920_v59  ;;  %v2918_v39 = vadd.f32 %v5252_v61, %v2894_v12  ;;  %v2899_v43 = vadd.f32 %v3900_v28, %v2693_v29  ;;  %v2719_v54 = vpop.f32.mrf.mxu0 }
 0x48e   : > { %v2846_v11 = vpop.f32.mrf.mxu1  ;;  %v2725_v29 = vadd.f32 %v3876_v45, %v5244_v56 }
 0x48f   : > { %4247 = vtanh.f32 %v2952_v8  ;;  %v2950_v31 = vadd.f32 %v2934_v23, %v2918_v39  ;;  %v2923_v63 = vadd.f32 %v5252_v61, %v2899_v43  ;;  %v2897_v57 = vadd.f32 %v2846_v11, %v2685_v18 }
 0x490   : > { %v3901_v0 = vpop.f32.mrf.mxu1  ;;  %v2942_v23 = vunpack.c.h.bf16 %v4280_v58  ;;  %v2717_v18 = vadd.f32 %v2716_v2, %v5246_v14 }
 0x491   : > { %4249 = vtanh.f32 %v2950_v31  ;;  %v2955_v32 = vadd.f32 %v2939_v53, %v2923_v63  ;;  %v2921_v6 = vadd.f32 %v5252_v61, %v2897_v57  ;;  %v2900_v25 = vadd.f32 %v3901_v0, %v2696_v44 }
 0x492   : > { %v2849_v41 = vpop.f32.mrf.mxu1  ;;  %v2947_v53 = vunpack.c.l.bf16 %v4281_v10  ;;  %v2728_v44 = vadd.f32 %v3877_v48, %v5248_v38 }
 0x493   : > { %4251 = vtanh.f32 %v2955_v32  ;;  %v2953_v13 = vadd.f32 %v2937_v19, %v2921_v6  ;;  %v2924_v37 = vadd.f32 %v5252_v61, %v2900_v25  ;;  %v2898_v52 = vadd.f32 %v2849_v41, %v2688_v24 }
 0x494   : > { %v3904_v46 = vpop.f32.mrf.mxu1  ;;  %v2945_v19 = vunpack.c.l.bf16 %v4282_v33  ;;  %v2720_v24 = vadd.f32 %v2719_v54, %v5250_v60  ;;  %v2946_v25 = vunpack.c.h.bf16 %v4282_v33 }
 0x495   : > { %4253 = vtanh.f32 %v2953_v13  ;;  %v2956_v3 = vadd.f32 %v2940_v7, %v2924_v37  ;;  %v2922_v9 = vadd.f32 %v5252_v61, %v2898_v52  ;;  %v2903_v4 = vadd.f32 %v3904_v46, %v2709_v17 }
 0x496   : > { %v2862_v36 = vpop.f32.mrf.mxu1  ;;  %v2948_v7 = vunpack.c.h.bf16 %v4281_v10 }
 0x497   : > { %4255 = vtanh.f32 %v2956_v3  ;;  %v2954_v15 = vadd.f32 %v2938_v35, %v2922_v9  ;;  %v2927_v26 = vadd.f32 %v5252_v61, %v2903_v4  ;;  %v2901_v16 = vadd.f32 %v2862_v36, %v2701_v40 }
 0x498   : > { %v4244_v5 = vpop.eup %4243  ;;  %v3905_v20 = vpop.f32.mrf.mxu1 }
 0x499   : > { %2983 = vst [vmem:[%s4717_s1 + $0x10] sm:$0xff] %v4244_v5  ;;  %4257 = vtanh.f32 %v2954_v15  ;;  %v2959_v22 = vadd.f32 %v2943_v1, %v2927_v26  ;;  %v2925_v27 = vadd.f32 %v5252_v61, %v2901_v16  ;;  %v2904_v51 = vadd.f32 %v3905_v20, %v2712_v47 }
 0x49a   : > { %v4246_v21 = vpop.eup %4245  ;;  %v2865_v30 = vpop.f32.mrf.mxu1 }
 0x49b   : > { %2981 = vst [vmem:[%s4717_s1] sm:$0xff] %v4246_v21  ;;  %4259 = vtanh.f32 %v2959_v22  ;;  %v2957_v50 = vadd.f32 %v2941_v49, %v2925_v27  ;;  %v2928_v55 = vadd.f32 %v5252_v61, %v2904_v51  ;;  %v2902_v59 = vadd.f32 %v2865_v30, %v2704_v42 }
 0x49c   : > { %v4248_v12 = vpop.eup %4247  ;;  %v3908_v28 = vpop.f32.mrf.mxu1 }
 0x49d   : > { %2984 = vst [vmem:[%s4717_s1 + $0x18] sm:$0xff] %v4248_v12  ;;  %4261 = vtanh.f32 %v2957_v50  ;;  %v2960_v8 = vadd.f32 %v2944_v34, %v2928_v55  ;;  %v2926_v56 = vadd.f32 %v5252_v61, %v2902_v59  ;;  %v2907_v39 = vadd.f32 %v3908_v28, %v2725_v29 }
 0x49e   : > { %v4250_v43 = vpop.eup %4249  ;;  %v2878_v11 = vpop.f32.mrf.mxu1 }
 0x49f   : > { %2982 = vst [vmem:[%s4717_s1 + $0x8] sm:$0xff] %v4250_v43  ;;  %4263 = vtanh.f32 %v2960_v8  ;;  %v2958_v31 = vadd.f32 %v2942_v23, %v2926_v56  ;;  %v2931_v14 = vadd.f32 %v5252_v61, %v2907_v39  ;;  %v2905_v63 = vadd.f32 %v2878_v11, %v2717_v18 }
 0x4a0   : > { %v4252_v57 = vpop.eup %4251  ;;  %v3909_v0 = vpop.f32.mrf.mxu1 }
 0x4a1   : > { %2987 = vst [vmem:[%s4717_s1 + $0x30] sm:$0xff] %v4252_v57  ;;  %4265 = vtanh.f32 %v2958_v31  ;;  %v2963_v45 = vadd.f32 %v2947_v53, %v2931_v14  ;;  %v2929_v32 = vadd.f32 %v5252_v61, %v2905_v63  ;;  %v2908_v38 = vadd.f32 %v3909_v0, %v2728_v44 }
 0x4a2   : > { %v4254_v6 = vpop.eup %4253  ;;  %v2881_v35 = vpop.f32.mrf.mxu1 }
 0x4a3   : > { %2985 = vst [vmem:[%s4717_s1 + $0x20] sm:$0xff] %v4254_v6  ;;  %4267 = vtanh.f32 %v2963_v45  ;;  %v2961_v17 = vadd.f32 %v2945_v19, %v2929_v32  ;;  %v2932_v41 = vadd.f32 %v5252_v61, %v2908_v38  ;;  %v2906_v60 = vadd.f32 %v2881_v35, %v2720_v24 }
 0x4a4   : > { %v4256_v13 = vpop.eup %4255 }
 0x4a5   : > { %2988 = vst [vmem:[%s4717_s1 + $0x38] sm:$0xff] %v4256_v13  ;;  %4269 = vtanh.f32 %v2961_v17  ;;  %v2964_v37 = vadd.f32 %v2948_v7, %v2932_v41  ;;  %v2930_v52 = vadd.f32 %v5252_v61, %v2906_v60 }
 0x4a6   : > { %v4258_v62 = vpop.eup %4257 }
 0x4a7   : > { %2986 = vst [vmem:[%s4717_s1 + $0x28] sm:$0xff] %v4258_v62  ;;  %4271 = vtanh.f32 %v2964_v37  ;;  %v2962_v1 = vadd.f32 %v2946_v25, %v2930_v52 }
 0x4a8   : > { %v4260_v40 = vpop.eup %4259 }
 0x4a9   : > { %2991 = vst [vmem:[%s4717_s1 + $0x50] sm:$0xff] %v4260_v40  ;;  %4273 = vtanh.f32 %v2962_v1 }
 0x4aa   : > { %v4262_v46 = vpop.eup %4261 }
 0x4ab   : > { %2989 = vst [vmem:[%s4717_s1 + $0x40] sm:$0xff] %v4262_v46 }
 0x4ac   : > { %v4264_v2 = vpop.eup %4263 }
 0x4ad   : > { %2992 = vst [vmem:[%s4717_s1 + $0x58] sm:$0xff] %v4264_v2 }
 0x4ae   : > { %v4266_v3 = vpop.eup %4265 }
 0x4af   : > { %2990 = vst [vmem:[%s4717_s1 + $0x48] sm:$0xff] %v4266_v3 }
 0x4b0   : > { %v4268_v61 = vpop.eup %4267 }
 0x4b1   : > { %2995 = vst [vmem:[%s4717_s1 + $0x70] sm:$0xff] %v4268_v61 }
 0x4b2   : > { %v4270_v9 = vpop.eup %4269 }
 0x4b3   : > { %2993 = vst [vmem:[%s4717_s1 + $0x60] sm:$0xff] %v4270_v9 }
 0x4b4   : > { %v4272_v4 = vpop.eup %4271 }
 0x4b5   : > { %2996 = vst [vmem:[%s4717_s1 + $0x78] sm:$0xff] %v4272_v4 }
 0x4b6   : > { %v4274_v58 = vpop.eup %4273 }
 0x4b7   : > { %2994 = vst [vmem:[%s4717_s1 + $0x68] sm:$0xff] %v4274_v58 }
 0x4b8   : > { %4401 = shalt.err (!%p4398_p7)
}
 0x4b9   : > { %s4402_s24 = scalar_lea.hbm %s5307_s16, 2048  ;;  %s4406_s1 = scalar_lea.hbm %s5369_s3, 8192 }
 0x4ba   : > { %p4403_p9 = scmp.ne.s32.totalorder %s5307_s16, %s4402_s24  ;;  %p4407_p13 = scmp.lt.s32.totalorder %s5307_s16, %s5369_s3 }
 0x4bb   : > { %p4408_p8 = scmp.lt.s32.totalorder %s4406_s1, %s4402_s24 }
 0x4bc   : > { %p4404_p0 = pnand %p4403_p9, %p4574_p3 }
 0x4bd   : > { %p4409_p10 = por %p4408_p8, %p4407_p13 }
 0x4be   : > { %p4405_p1 = pneg %p4404_p0 }
 0x4c0   : > { %p4410_p12 = pnand %p4409_p10, %p4405_p1 }
 0x4c2   : > { %4413 = shalt.err (!%p4410_p12)
}
 0x4c3   : > { %s4500_s22 = smov 128   ;;  %s4501_s23 = smov 8  }
 0x4c4   : > { %3922 = dma.vmem_to_hbm [thread:$0]  (%p4574_p3), %s5309_s4, 2048, %s5307_s16, %s5315_s20, %s4500_s22, %s4500_s22, %s4501_s23  }
 0x4c5 PF: > { %p3941_p11 = scmp.ge.s32.totalorder %s4490_s19, 2  ;;  %s3029_s8 = sand.u32 1, %s4462_s12  }
 0x4c6   : > { %p5414_p2 = scmp.ne.s32.totalorder %s5383_s27, 0  ;;  %s3030_s21 = scalar_lea.sflag [#allocation6], %s3029_s8 }
 0x4c8   : > { %p3932_p4 = pnand %p3941_p11, %p5414_p2 }
 0x4ca   : > { %p3933_p5 = pneg %p3932_p4 }
 0x4cc   : > { %4457 = dma.done.wait (%p3933_p5), %s3030_s21, 2048  }
 0x4cd   : > { %4459 = vsyncadd (%p3933_p5), %s3030_s21, 4294965248  ;;  %s18_s19 = sadd.s32 1, %s4490_s19   ;;  %s5415_s16 = sld [smem:[#allocation20_spill]] }
 0x4ce   : > { %p15_p6 = scmp.ge.s32.totalorder %s18_s19, 6   ;;  %s5416_s26 = sld [smem:[#allocation21_spill]] }
 0x4cf   : > { %s5417_s18 = sld [smem:[#allocation22_spill]]  ;;  %s5418_s12 = smov %s4466_s13 }
 0x4d0   : > { %s5419_s13 = smov %s4470_s14  ;;  %s5420_s14 = smov %s4601_s5 }
 0x4d1   : > { %s5421_s15 = smov %s4482_s17  ;;  %17 = sbr.rel (!%p15_p6) target bundleno = 10 (0xa), region = 106 }
 0x4d4   : > { %s5422_s17 = smov %s5416_s26 }
 0x4d6   :  { %3035 = vsyncpa [#allocation5], 1 }
 0x4d7   :  { %3037 = vsyncpa [#allocation5 + $0x1], 1 }
 0x4d8   :  { %3038 = vsyncpa [#allocation8], 1 }
 0x4d9   :  { %3039 = vsyncpa [#allocation6], 1 }
 0x4da   :  { %3041 = vsyncpa [#allocation6 + $0x1], 1 }
 0x4db   :  { %3042 = vsyncmov [#allocation3] }
 0x4de   :  { %s3043_s27 = vpop.sfrf %3042 }
 0x4df   :  { %p3292_p3 = scmp.ne.s32.totalorder %s3043_s27, 0 }
 0x4e1   :  { %3047 = shalt.err (%p3292_p3)  }
 0x4e2   :  { %3049 = vsyncmov [#allocation3 + $0x1] }
 0x4e5   :  { %s3050_s5 = vpop.sfrf %3049 }
 0x4e6   :  { %p3293_p7 = scmp.ne.s32.totalorder %s3050_s5, 0 }
 0x4e8   :  { %3054 = shalt.err (%p3293_p7)  }

</bundles_post_ra>
